<compile_context>
chip_gen: v5e
topology: v5e:2x2
jax: 0.10.0
libtpu: 0.0.40
codegen_flags: <defaults>
</compile_context>

<pallas_src>
import functools
import math

import jax
import jax.numpy as jnp
import numpy as np
from jax.experimental import pallas as pl
from jax.experimental.pallas import tpu as pltpu


def _layernorm(z, gamma, beta, eps=1e-5):
    # f32 math throughout (mean/var/rsqrt on the VPU/EUP).
    mu = jnp.mean(z, axis=-1, keepdims=True)
    var = jnp.mean((z - mu) ** 2, axis=-1, keepdims=True)
    return (z - mu) * jax.lax.rsqrt(var + eps) * gamma + beta


def transformer_block_kernel(
    xq_ref,                       # (1, TQ, E) f32   query-row tile of x (residual/LN path)
    xkv_ref,                      # (1, S,  E) bf16  full sequence (K/V source, qi==0 only)
    wq_ref, bq_ref,               # (E, E) bf16 (pre-scaled by 1/sqrt(d)), (1, E) f32 (pre-scaled)
    wkv_ref, bkv_ref,             # (E, 2E) bf16 fused K|V weight, (1, 2E) f32 bias
    wo_ref, bo_ref,               # (E, E) bf16, (1, E) f32
    g0_ref, b0_ref,               # (1, E) f32       LayerNorm0 gamma/beta
    w1_ref, b1_ref,               # (E, F) bf16, (1, F) f32
    w2_ref, b2_ref,               # (F, E) bf16, (1, E) f32
    g1_ref, bt1_ref,              # (1, E) f32       LayerNorm1 gamma/beta
    o_ref,                        # (1, TQ, E) f32
    k_cache, v_cache,             # scratch (S, E) bf16 — persist across the qi sweep
    *,
    num_heads,
    kv_chunk,
):
    x_q = xq_ref[0]               # (TQ, E) f32 (kept f32 for residual / LN)
    TQ, E = x_q.shape
    S = k_cache.shape[0]
    H = num_heads
    d = E // H

    # ---- K/V projection: computed ONCE per batch element (qi == 0), cached ----
    @pl.when(pl.program_id(1) == 0)
    def _fill_kv_cache():
        x_kv = xkv_ref[0]                                        # (S, E) bf16
        kv = jnp.dot(x_kv, wkv_ref[...],
                     preferred_element_type=jnp.float32) + bkv_ref[...]   # (S, 2E) f32
        k_cache[...] = kv[:, :E].astype(jnp.bfloat16)
        v_cache[...] = kv[:, E:].astype(jnp.bfloat16)

    # ---- Q projection for this query tile (scale already folded into wq/bq) ----
    xq_b = x_q.astype(jnp.bfloat16)
    q = jnp.dot(xq_b, wq_ref[...], preferred_element_type=jnp.float32) + bq_ref[...]
    qh = q.reshape(TQ, H, d).astype(jnp.bfloat16)                # (TQ, H, d)

    # ---- KV-chunked online softmax (working set bounded by (H, TQ, kv_chunk)) ----
    # NOTE: if S % TQ != 0 the padded query rows see garbage scores; their
    # results are discarded by the masked output write, so this is benign.
    m = jnp.full((H, TQ, 1), -jnp.inf, dtype=jnp.float32)
    l = jnp.zeros((H, TQ, 1), dtype=jnp.float32)
    acc = jnp.zeros((H, TQ, d), dtype=jnp.float32)
    for start in range(0, S, kv_chunk):
        size = min(kv_chunk, S - start)
        kh = k_cache[pl.ds(start, size), :].reshape(size, H, d)  # (TK, H, d) bf16
        vh = v_cache[pl.ds(start, size), :].reshape(size, H, d)
        s = jnp.einsum("qhd,khd->hqk", qh, kh,
                       preferred_element_type=jnp.float32)       # (H, TQ, TK) f32
        m_new = jnp.maximum(m, jnp.max(s, axis=-1, keepdims=True))
        alpha = jnp.exp(m - m_new)
        p = jnp.exp(s - m_new)
        l = alpha * l + jnp.sum(p, axis=-1, keepdims=True)
        acc = alpha * acc + jnp.einsum("hqk,khd->hqd", p.astype(jnp.bfloat16), vh,
                                       preferred_element_type=jnp.float32)
        m = m_new

    attn = acc * pl.reciprocal(l, approx=True)                   # (H, TQ, d) f32
    attn = jnp.transpose(attn, (1, 0, 2)).reshape(TQ, E)         # (TQ, E)

    # ---- output projection + residual + LayerNorm0 ----
    y = jnp.dot(attn.astype(jnp.bfloat16), wo_ref[...],
                preferred_element_type=jnp.float32) + bo_ref[...]
    x1 = _layernorm(x_q + y, g0_ref[...], b0_ref[...])

    # ---- MLP: Linear -> ReLU -> Linear, residual + LayerNorm1 ----
    h1 = jnp.maximum(
        jnp.dot(x1.astype(jnp.bfloat16), w1_ref[...],
                preferred_element_type=jnp.float32) + b1_ref[...], 0.0)
    y2 = jnp.dot(h1.astype(jnp.bfloat16), w2_ref[...],
                 preferred_element_type=jnp.float32) + b2_ref[...]
    x2 = _layernorm(x1 + y2, g1_ref[...], bt1_ref[...])

    o_ref[0] = x2.astype(o_ref.dtype)


def transformer_block(x, params, num_heads, *, q_tile=128, kv_chunk=512):
    B, S, E = x.shape
    assert E % num_heads == 0
    d = E // num_heads
    dff = params["w1"].shape[1]
    scale = 1.0 / math.sqrt(d)

    # Fold the attention scale into the Q weight/bias; fuse K and V projection
    # weights into one (E, 2E) matrix; cast weight matrices to bf16 for the MXU
    # (biases / LN params stay f32 and are added to the f32 accumulator).
    w_qkv, b_qkv = params["w_qkv"], params["b_qkv"]
    wq = (w_qkv[:, :E] * scale).astype(jnp.bfloat16)
    bq = b_qkv[:, :E] * scale
    wkv = w_qkv[:, E:].astype(jnp.bfloat16)          # (E, 2E)  columns = [K | V]
    bkv = b_qkv[:, E:]                               # (1, 2E)

    weight_args = [
        wq, bq, wkv, bkv,
        params["w_out"].astype(jnp.bfloat16), params["b_out"],
        params["ln0_g"], params["ln0_b"],
        params["w1"].astype(jnp.bfloat16), params["b1"],
        params["w2"].astype(jnp.bfloat16), params["b2"],
        params["ln1_g"], params["ln1_b"],
    ]

    # Query-side tiling: each grid step handles (1, tq, E) query rows against
    # the cached full-sequence K/V.  KV chunking bounds the score working set.
    tq = S if S <= q_tile else q_tile
    nq = pl.cdiv(S, tq)
    tkv = S if S <= kv_chunk else kv_chunk

    # bf16 copy of x for the K/V source path (halves its VMEM residency and
    # HBM traffic); the query/residual path keeps f32 precision.
    x_kv = x.astype(jnp.bfloat16)

    kernel = functools.partial(transformer_block_kernel,
                               num_heads=num_heads, kv_chunk=tkv)

    # ---- rough VMEM requirement -> explicit limit with headroom (<= 48 MiB) ----
    def _nbytes(a):
        return int(np.prod(a.shape)) * a.dtype.itemsize
    weight_bytes = sum(_nbytes(w) for w in weight_args)
    resident = (weight_bytes                    # weights (single-buffered)
                + 2 * 2 * S * E                 # xkv bf16, double-buffered
                + 2 * 2 * S * E                 # K/V bf16 scratch caches
                + 2 * 2 * tq * E * 4)           # xq + out f32 tiles, double-buffered
    work = 4 * num_heads * tq * tkv * 4 + 8 * tq * max(E, dff) * 4
    vmem_limit = min(48 << 20, max(32 << 20, 2 * (resident + work) + (4 << 20)))

    # ---- cost estimate (helps XLA schedule around the custom call) ----
    flops = (2 * B * S * E * 3 * E            # QKV projections
             + 4 * B * S * S * E              # scores + PV
             + 2 * B * S * E * E              # output projection
             + 4 * B * S * E * dff)           # MLP
    transcendentals = B * num_heads * S * S
    bytes_accessed = (B * S * E * 4           # x (f32)
                      + B * S * E * 2         # x_kv (bf16)
                      + B * S * E * 4         # output (f32)
                      + weight_bytes)

    def run(single_buffer_weights):
        def w_spec(arr):
            # Constant block index -> weights stay resident across the grid;
            # Buffered(1) avoids wasting VMEM on a useless second buffer.
            if single_buffer_weights:
                return pl.BlockSpec(arr.shape, lambda b, qi: (0, 0),
                                    pipeline_mode=pl.Buffered(1))
            return pl.BlockSpec(arr.shape, lambda b, qi: (0, 0))

        in_specs = [
            pl.BlockSpec((1, tq, E), lambda b, qi: (b, qi, 0)),   # x query tile (f32)
            pl.BlockSpec((1, S, E), lambda b, qi: (b, 0, 0)),     # x K/V source (bf16), per-b resident
        ] + [w_spec(w) for w in weight_args]
        out_spec = pl.BlockSpec((1, tq, E), lambda b, qi: (b, qi, 0))

        fn = pl.pallas_call(
            kernel,
            out_shape=jax.ShapeDtypeStruct((B, S, E), jnp.float32),
            grid=(B, nq),
            in_specs=in_specs,
            out_specs=out_spec,
            scratch_shapes=[pltpu.VMEM((S, E), jnp.bfloat16),     # K cache
                            pltpu.VMEM((S, E), jnp.bfloat16)],    # V cache
            compiler_params=pltpu.CompilerParams(
                # qi carries the K/V cache -> "arbitrary"; B feeds the two v7x
                # TensorCores -> "parallel".
                dimension_semantics=("parallel", "arbitrary"),
                vmem_limit_bytes=int(vmem_limit),
            ),
            cost_estimate=pl.CostEstimate(flops=int(flops),
                                          transcendentals=int(transcendentals),
                                          bytes_accessed=int(bytes_accessed)),
        )
        return jax.block_until_ready(fn(x, x_kv, *weight_args))

    try:
        return run(True)
    except Exception:
        # pipeline_mode=pl.Buffered(1) not supported by this JAX version:
        # fall back to default (double-buffered) resident weight blocks.
        return run(False)


def reference_transformer_block(x, params, num_heads):
    """Pure-JAX f32 reference with the eval-mode PyTorch module's semantics."""
    B, S, E = x.shape
    d = E // num_heads
    qkv = x @ params["w_qkv"] + params["b_qkv"]           # (B, S, 3E)
    q, k, v = qkv[..., :E], qkv[..., E:2 * E], qkv[..., 2 * E:]

    def split_heads(t):  # (B, S, E) -> (B, H, S, d)
        return t.reshape(B, S, num_heads, d).transpose(0, 2, 1, 3)

    qh, kh, vh = split_heads(q), split_heads(k), split_heads(v)
    s = jnp.einsum("bhqd,bhkd->bhqk", qh, kh) / math.sqrt(d)
    p = jax.nn.softmax(s, axis=-1)
    o = jnp.einsum("bhqk,bhkd->bhqd", p, vh).transpose(0, 2, 1, 3).reshape(B, S, E)
    y = o @ params["w_out"] + params["b_out"]

    def ln(z, g, b):
        mu = jnp.mean(z, axis=-1, keepdims=True)
        var = jnp.mean((z - mu) ** 2, axis=-1, keepdims=True)
        return (z - mu) * jax.lax.rsqrt(var + 1e-5) * g + b

    x1 = ln(x + y, params["ln0_g"], params["ln0_b"])
    h1 = jnp.maximum(x1 @ params["w1"] + params["b1"], 0.0)
    y2 = h1 @ params["w2"] + params["b2"]
    return ln(x1 + y2, params["ln1_g"], params["ln1_b"])


def init_params(key, embed_dim, dim_feedforward):
    keys = jax.random.split(key, 8)
    scale = 0.05
    return {
        "w_qkv": jax.random.normal(keys[0], (embed_dim, 3 * embed_dim), jnp.float32) * scale,
        "b_qkv": jax.random.normal(keys[1], (1, 3 * embed_dim), jnp.float32) * scale,
        "w_out": jax.random.normal(keys[2], (embed_dim, embed_dim), jnp.float32) * scale,
        "b_out": jax.random.normal(keys[3], (1, embed_dim), jnp.float32) * scale,
        "ln0_g": jnp.ones((1, embed_dim), jnp.float32),
        "ln0_b": jnp.zeros((1, embed_dim), jnp.float32),
        "w1": jax.random.normal(keys[4], (embed_dim, dim_feedforward), jnp.float32) * scale,
        "b1": jax.random.normal(keys[5], (1, dim_feedforward), jnp.float32) * scale,
        "w2": jax.random.normal(keys[6], (dim_feedforward, embed_dim), jnp.float32) * scale,
        "b2": jax.random.normal(keys[7], (1, embed_dim), jnp.float32) * scale,
        "ln1_g": jnp.ones((1, embed_dim), jnp.float32),
        "ln1_b": jnp.zeros((1, embed_dim), jnp.float32),
    }


if __name__ == "__main__":
    B, S = 2, 8
    embed_dim, num_heads, dim_feedforward = 32, 4, 64

    key = jax.random.PRNGKey(0)
    key_x, key_p = jax.random.split(key)
    x = jax.random.normal(key_x, (B, S, embed_dim), jnp.float32)
    params = init_params(key_p, embed_dim, dim_feedforward)

    out = transformer_block(x, params, num_heads)
    out = jax.block_until_ready(out)

    ref = jax.block_until_ready(reference_transformer_block(x, params, num_heads))
    # Tolerance loosened vs a pure-f32 path: bf16 MXU operands, bf16 K/V cache
    # and approx-reciprocal softmax normalization give ~1e-3-level deviations.
    np.testing.assert_allclose(np.asarray(out), np.asarray(ref), rtol=2e-2, atol=2e-2)

    print("KERNEL_OK")
</pallas_src>

<mosaic_0001>
module attributes {stable_mosaic.version = 11 : i64} {
  func.func @transformer_block_kernel(%arg0: i32, %arg1: i32, %arg2: memref<1x8x32xf32, #tpu.memory_space<vmem>>, %arg3: memref<1x8x32xbf16, #tpu.memory_space<vmem>>, %arg4: memref<32x32xbf16, #tpu.memory_space<vmem>>, %arg5: memref<1x32xf32, #tpu.memory_space<vmem>>, %arg6: memref<32x64xbf16, #tpu.memory_space<vmem>>, %arg7: memref<1x64xf32, #tpu.memory_space<vmem>>, %arg8: memref<32x32xbf16, #tpu.memory_space<vmem>>, %arg9: memref<1x32xf32, #tpu.memory_space<vmem>>, %arg10: memref<1x32xf32, #tpu.memory_space<vmem>>, %arg11: memref<1x32xf32, #tpu.memory_space<vmem>>, %arg12: memref<32x64xbf16, #tpu.memory_space<vmem>>, %arg13: memref<1x64xf32, #tpu.memory_space<vmem>>, %arg14: memref<64x32xbf16, #tpu.memory_space<vmem>>, %arg15: memref<1x32xf32, #tpu.memory_space<vmem>>, %arg16: memref<1x32xf32, #tpu.memory_space<vmem>>, %arg17: memref<1x32xf32, #tpu.memory_space<vmem>>, %arg18: memref<1x8x32xf32, #tpu.memory_space<vmem>>, %arg19: memref<8x32xbf16, #tpu.memory_space<vmem>>, %arg20: memref<8x32xbf16, #tpu.memory_space<vmem>>) attributes {dimension_semantics = [#tpu.dimension_semantics<parallel>, #tpu.dimension_semantics<arbitrary>], iteration_bounds = array<i64: 2, 1>, scalar_prefetch = 0 : i64, scratch_operands = 2 : i64, tpu.core_type = #tpu.core_type<tc>, window_params = [{transform_indices = @transform_0, window_bounds = array<i64: 1, 8, 32>}, {transform_indices = @transform_1, window_bounds = array<i64: 1, 8, 32>}, {pipeline_mode = #tpu.pipeline_mode<synchronous>, transform_indices = @transform_2, window_bounds = array<i64: 32, 32>}, {pipeline_mode = #tpu.pipeline_mode<synchronous>, transform_indices = @transform_3, window_bounds = array<i64: 1, 32>}, {pipeline_mode = #tpu.pipeline_mode<synchronous>, transform_indices = @transform_4, window_bounds = array<i64: 32, 64>}, {pipeline_mode = #tpu.pipeline_mode<synchronous>, transform_indices = @transform_5, window_bounds = array<i64: 1, 64>}, {pipeline_mode = #tpu.pipeline_mode<synchronous>, transform_indices = @transform_6, window_bounds = array<i64: 32, 32>}, {pipeline_mode = #tpu.pipeline_mode<synchronous>, transform_indices = @transform_7, window_bounds = array<i64: 1, 32>}, {pipeline_mode = #tpu.pipeline_mode<synchronous>, transform_indices = @transform_8, window_bounds = array<i64: 1, 32>}, {pipeline_mode = #tpu.pipeline_mode<synchronous>, transform_indices = @transform_9, window_bounds = array<i64: 1, 32>}, {pipeline_mode = #tpu.pipeline_mode<synchronous>, transform_indices = @transform_10, window_bounds = array<i64: 32, 64>}, {pipeline_mode = #tpu.pipeline_mode<synchronous>, transform_indices = @transform_11, window_bounds = array<i64: 1, 64>}, {pipeline_mode = #tpu.pipeline_mode<synchronous>, transform_indices = @transform_12, window_bounds = array<i64: 64, 32>}, {pipeline_mode = #tpu.pipeline_mode<synchronous>, transform_indices = @transform_13, window_bounds = array<i64: 1, 32>}, {pipeline_mode = #tpu.pipeline_mode<synchronous>, transform_indices = @transform_14, window_bounds = array<i64: 1, 32>}, {pipeline_mode = #tpu.pipeline_mode<synchronous>, transform_indices = @transform_15, window_bounds = array<i64: 1, 32>}, {transform_indices = @transform_16, window_bounds = array<i64: 1, 8, 32>}]} {
    %c0 = arith.constant 0 : index
    %c0_0 = arith.constant 0 : index
    %c0_1 = arith.constant 0 : index
    %0 = vector.load %arg2[%c0, %c0_0, %c0_1] : memref<1x8x32xf32, #tpu.memory_space<vmem>>, vector<1x8x32xf32>
    %1 = vector.shape_cast %0 : vector<1x8x32xf32> to vector<8x32xf32>
    %c0_i32 = arith.constant 0 : i32
    %2 = arith.cmpi eq, %arg1, %c0_i32 : i32
    %3 = arith.extui %2 : i1 to i32
    %c0_i32_2 = arith.constant 0 : i32
    %4 = arith.cmpi ne, %3, %c0_i32_2 : i32
    scf.if %4 {
      %c0_55 = arith.constant 0 : index
      %c0_56 = arith.constant 0 : index
      %c0_57 = arith.constant 0 : index
      %116 = vector.load %arg3[%c0_55, %c0_56, %c0_57] : memref<1x8x32xbf16, #tpu.memory_space<vmem>>, vector<1x8x32xbf16>
      %117 = vector.shape_cast %116 : vector<1x8x32xbf16> to vector<8x32xbf16>
      %c0_58 = arith.constant 0 : index
      %c0_59 = arith.constant 0 : index
      %118 = vector.load %arg6[%c0_58, %c0_59] : memref<32x64xbf16, #tpu.memory_space<vmem>>, vector<32x64xbf16>
      %cst_60 = arith.constant dense<0.000000e+00> : vector<8x64xf32>
      %119 = tpu.matmul %117, %118, %cst_60 {dimension_numbers = #tpu.dot_dimension_numbers<[1], [0], [0], [1], [0, 0, 1, 1], [], []>} : vector<8x32xbf16>, vector<32x64xbf16>, vector<8x64xf32> -> vector<8x64xf32>
      %c0_61 = arith.constant 0 : index
      %c0_62 = arith.constant 0 : index
      %120 = vector.load %arg7[%c0_61, %c0_62] : memref<1x64xf32, #tpu.memory_space<vmem>>, vector<1x64xf32>
      %121 = vector.broadcast %120 : vector<1x64xf32> to vector<8x64xf32>
      %122 = arith.addf %119, %121 : vector<8x64xf32>
      %123 = vector.extract_strided_slice %122 {offsets = [0, 0], sizes = [8, 32], strides = [1, 1]} : vector<8x64xf32> to vector<8x32xf32>
      %124 = arith.truncf %123 : vector<8x32xf32> to vector<8x32xbf16>
      %c0_63 = arith.constant 0 : index
      %c0_64 = arith.constant 0 : index
      %125 = vector.load %arg19[%c0_63, %c0_64] : memref<8x32xbf16, #tpu.memory_space<vmem>>, vector<8x32xbf16>
      tpu.vector_store %arg19[%c0_63, %c0_64], %124 {strides = array<i32>} : memref<8x32xbf16, #tpu.memory_space<vmem>>, vector<8x32xbf16>,
      %126 = vector.extract_strided_slice %122 {offsets = [0, 32], sizes = [8, 32], strides = [1, 1]} : vector<8x64xf32> to vector<8x32xf32>
      %127 = arith.truncf %126 : vector<8x32xf32> to vector<8x32xbf16>
      %c0_65 = arith.constant 0 : index
      %c0_66 = arith.constant 0 : index
      %128 = vector.load %arg20[%c0_65, %c0_66] : memref<8x32xbf16, #tpu.memory_space<vmem>>, vector<8x32xbf16>
      tpu.vector_store %arg20[%c0_65, %c0_66], %127 {strides = array<i32>} : memref<8x32xbf16, #tpu.memory_space<vmem>>, vector<8x32xbf16>,
    } else {
    }
    %5 = arith.truncf %1 : vector<8x32xf32> to vector<8x32xbf16>
    %c0_3 = arith.constant 0 : index
    %c0_4 = arith.constant 0 : index
    %6 = vector.load %arg4[%c0_3, %c0_4] : memref<32x32xbf16, #tpu.memory_space<vmem>>, vector<32x32xbf16>
    %cst = arith.constant dense<0.000000e+00> : vector<8x32xf32>
    %7 = tpu.matmul %5, %6, %cst {dimension_numbers = #tpu.dot_dimension_numbers<[1], [0], [0], [1], [0, 0, 1, 1], [], []>} : vector<8x32xbf16>, vector<32x32xbf16>, vector<8x32xf32> -> vector<8x32xf32>
    %c0_5 = arith.constant 0 : index
    %c0_6 = arith.constant 0 : index
    %8 = vector.load %arg5[%c0_5, %c0_6] : memref<1x32xf32, #tpu.memory_space<vmem>>, vector<1x32xf32>
    %9 = vector.broadcast %8 : vector<1x32xf32> to vector<8x32xf32>
    %10 = arith.addf %7, %9 : vector<8x32xf32>
    %11 = vector.shape_cast %10 : vector<8x32xf32> to vector<8x4x8xf32>
    %12 = arith.truncf %11 : vector<8x4x8xf32> to vector<8x4x8xbf16>
    %cst_7 = arith.constant 0xFF800000 : f32
    %13 = vector.broadcast %cst_7 : f32 to vector<4x8x1xf32>
    %cst_8 = arith.constant 0.000000e+00 : f32
    %14 = vector.broadcast %cst_8 : f32 to vector<4x8x1xf32>
    %cst_9 = arith.constant 0.000000e+00 : f32
    %15 = vector.broadcast %cst_9 : f32 to vector<4x8x8xf32>
    %c0_10 = arith.constant 0 : index
    %c0_11 = arith.constant 0 : index
    %16 = vector.load %arg19[%c0_10, %c0_11] : memref<8x32xbf16, #tpu.memory_space<vmem>>, vector<8x32xbf16>
    %17 = vector.shape_cast %16 : vector<8x32xbf16> to vector<8x4x8xbf16>
    %c0_12 = arith.constant 0 : index
    %c0_13 = arith.constant 0 : index
    %18 = vector.load %arg20[%c0_12, %c0_13] : memref<8x32xbf16, #tpu.memory_space<vmem>>, vector<8x32xbf16>
    %19 = vector.shape_cast %18 : vector<8x32xbf16> to vector<8x4x8xbf16>
    "tpu.trace_start"() <{level = 10 : i32, message = "qhd,khd->hqk"}> : () -> ()
    %cst_14 = arith.constant dense<0.000000e+00> : vector<4x8x8xf32>
    %20 = tpu.matmul %12, %17, %cst_14 {dimension_numbers = #tpu.dot_dimension_numbers<[2], [2], [0], [0], [0, 1, 0, 0, 1, 0], [1], [1]>} : vector<8x4x8xbf16>, vector<8x4x8xbf16>, vector<4x8x8xf32> -> vector<4x8x8xf32>
    "tpu.trace_stop"() : () -> ()
    %cst_15 = arith.constant dense<0xFF800000> : vector<4x8xf32>
    %21 = vector.multi_reduction <maximumf>, %20, %cst_15 [2] : vector<4x8x8xf32> to vector<4x8xf32>
    %22 = vector.shape_cast %21 : vector<4x8xf32> to vector<4x8x1xf32>
    %23 = arith.maximumf %13, %22 : vector<4x8x1xf32>
    %24 = arith.subf %13, %23 : vector<4x8x1xf32>
    %25 = math.exp %24 : vector<4x8x1xf32>
    %26 = vector.broadcast %23 : vector<4x8x1xf32> to vector<4x8x8xf32>
    %27 = arith.subf %20, %26 : vector<4x8x8xf32>
    %28 = math.exp %27 : vector<4x8x8xf32>
    %29 = arith.mulf %25, %14 : vector<4x8x1xf32>
    %cst_16 = arith.constant dense<0.000000e+00> : vector<4x8xf32>
    %30 = vector.multi_reduction <add>, %28, %cst_16 [2] : vector<4x8x8xf32> to vector<4x8xf32>
    %31 = vector.shape_cast %30 : vector<4x8xf32> to vector<4x8x1xf32>
    %32 = arith.addf %29, %31 : vector<4x8x1xf32>
    %33 = vector.broadcast %25 : vector<4x8x1xf32> to vector<4x8x8xf32>
    %34 = arith.mulf %33, %15 : vector<4x8x8xf32>
    %35 = arith.truncf %28 : vector<4x8x8xf32> to vector<4x8x8xbf16>
    "tpu.trace_start"() <{level = 10 : i32, message = "hqk,khd->hqd"}> : () -> ()
    %cst_17 = arith.constant dense<0.000000e+00> : vector<4x8x8xf32>
    %36 = tpu.matmul %35, %19, %cst_17 {dimension_numbers = #tpu.dot_dimension_numbers<[2], [0], [1], [2], [0, 0, 0, 1, 1, 2], [0], [1]>} : vector<4x8x8xbf16>, vector<8x4x8xbf16>, vector<4x8x8xf32> -> vector<4x8x8xf32>
    "tpu.trace_stop"() : () -> ()
    %37 = arith.addf %34, %36 : vector<4x8x8xf32>
    %38 = tpu.reciprocal %32 {approx = true} : vector<4x8x1xf32> -> vector<4x8x1xf32>
    %39 = vector.broadcast %38 : vector<4x8x1xf32> to vector<4x8x8xf32>
    %40 = arith.mulf %37, %39 : vector<4x8x8xf32>
    %41 = tpu.transpose %40, [1, 0, 2] : vector<4x8x8xf32> -> vector<8x4x8xf32>
    %42 = vector.shape_cast %41 : vector<8x4x8xf32> to vector<8x32xf32>
    %43 = arith.truncf %42 : vector<8x32xf32> to vector<8x32xbf16>
    %c0_18 = arith.constant 0 : index
    %c0_19 = arith.constant 0 : index
    %44 = vector.load %arg8[%c0_18, %c0_19] : memref<32x32xbf16, #tpu.memory_space<vmem>>, vector<32x32xbf16>
    %cst_20 = arith.constant dense<0.000000e+00> : vector<8x32xf32>
    %45 = tpu.matmul %43, %44, %cst_20 {dimension_numbers = #tpu.dot_dimension_numbers<[1], [0], [0], [1], [0, 0, 1, 1], [], []>} : vector<8x32xbf16>, vector<32x32xbf16>, vector<8x32xf32> -> vector<8x32xf32>
    %c0_21 = arith.constant 0 : index
    %c0_22 = arith.constant 0 : index
    %46 = vector.load %arg9[%c0_21, %c0_22] : memref<1x32xf32, #tpu.memory_space<vmem>>, vector<1x32xf32>
    %47 = vector.broadcast %46 : vector<1x32xf32> to vector<8x32xf32>
    %48 = arith.addf %45, %47 : vector<8x32xf32>
    %49 = arith.addf %1, %48 : vector<8x32xf32>
    %c0_23 = arith.constant 0 : index
    %c0_24 = arith.constant 0 : index
    %50 = vector.load %arg10[%c0_23, %c0_24] : memref<1x32xf32, #tpu.memory_space<vmem>>, vector<1x32xf32>
    %c0_25 = arith.constant 0 : index
    %c0_26 = arith.constant 0 : index
    %51 = vector.load %arg11[%c0_25, %c0_26] : memref<1x32xf32, #tpu.memory_space<vmem>>, vector<1x32xf32>
    %cst_27 = arith.constant dense<0.000000e+00> : vector<8xf32>
    %52 = vector.multi_reduction <add>, %49, %cst_27 [1] : vector<8x32xf32> to vector<8xf32>
    %53 = vector.shape_cast %52 : vector<8xf32> to vector<8x1xf32>
    %cst_28 = arith.constant 3.200000e+01 : f32
    %54 = vector.broadcast %cst_28 : f32 to vector<8x1xf32>
    %55 = arith.divf %53, %54 : vector<8x1xf32>
    %56 = vector.broadcast %55 : vector<8x1xf32> to vector<8x32xf32>
    %57 = arith.subf %49, %56 : vector<8x32xf32>
    %58 = arith.mulf %57, %57 : vector<8x32xf32>
    %cst_29 = arith.constant dense<0.000000e+00> : vector<8xf32>
    %59 = vector.multi_reduction <add>, %58, %cst_29 [1] : vector<8x32xf32> to vector<8xf32>
    %60 = vector.shape_cast %59 : vector<8xf32> to vector<8x1xf32>
    %cst_30 = arith.constant 3.200000e+01 : f32
    %61 = vector.broadcast %cst_30 : f32 to vector<8x1xf32>
    %62 = arith.divf %60, %61 : vector<8x1xf32>
    %63 = vector.broadcast %55 : vector<8x1xf32> to vector<8x32xf32>
    %64 = arith.subf %49, %63 : vector<8x32xf32>
    %cst_31 = arith.constant 9.99999974E-6 : f32
    %65 = vector.broadcast %cst_31 : f32 to vector<8x1xf32>
    %66 = arith.addf %62, %65 : vector<8x1xf32>
    %67 = math.rsqrt %66 : vector<8x1xf32>
    %68 = vector.broadcast %67 : vector<8x1xf32> to vector<8x32xf32>
    %69 = arith.mulf %64, %68 : vector<8x32xf32>
    %70 = vector.broadcast %50 : vector<1x32xf32> to vector<8x32xf32>
    %71 = arith.mulf %69, %70 : vector<8x32xf32>
    %72 = vector.broadcast %51 : vector<1x32xf32> to vector<8x32xf32>
    %73 = arith.addf %71, %72 : vector<8x32xf32>
    %74 = arith.truncf %73 : vector<8x32xf32> to vector<8x32xbf16>
    %c0_32 = arith.constant 0 : index
    %c0_33 = arith.constant 0 : index
    %75 = vector.load %arg12[%c0_32, %c0_33] : memref<32x64xbf16, #tpu.memory_space<vmem>>, vector<32x64xbf16>
    %cst_34 = arith.constant dense<0.000000e+00> : vector<8x64xf32>
    %76 = tpu.matmul %74, %75, %cst_34 {dimension_numbers = #tpu.dot_dimension_numbers<[1], [0], [0], [1], [0, 0, 1, 1], [], []>} : vector<8x32xbf16>, vector<32x64xbf16>, vector<8x64xf32> -> vector<8x64xf32>
    %c0_35 = arith.constant 0 : index
    %c0_36 = arith.constant 0 : index
    %77 = vector.load %arg13[%c0_35, %c0_36] : memref<1x64xf32, #tpu.memory_space<vmem>>, vector<1x64xf32>
    %78 = vector.broadcast %77 : vector<1x64xf32> to vector<8x64xf32>
    %79 = arith.addf %76, %78 : vector<8x64xf32>
    %cst_37 = arith.constant 0.000000e+00 : f32
    %80 = vector.broadcast %cst_37 : f32 to vector<8x64xf32>
    %81 = arith.maximumf %79, %80 : vector<8x64xf32>
    %82 = arith.truncf %81 : vector<8x64xf32> to vector<8x64xbf16>
    %c0_38 = arith.constant 0 : index
    %c0_39 = arith.constant 0 : index
    %83 = vector.load %arg14[%c0_38, %c0_39] : memref<64x32xbf16, #tpu.memory_space<vmem>>, vector<64x32xbf16>
    %cst_40 = arith.constant dense<0.000000e+00> : vector<8x32xf32>
    %84 = tpu.matmul %82, %83, %cst_40 {dimension_numbers = #tpu.dot_dimension_numbers<[1], [0], [0], [1], [0, 0, 1, 1], [], []>} : vector<8x64xbf16>, vector<64x32xbf16>, vector<8x32xf32> -> vector<8x32xf32>
    %c0_41 = arith.constant 0 : index
    %c0_42 = arith.constant 0 : index
    %85 = vector.load %arg15[%c0_41, %c0_42] : memref<1x32xf32, #tpu.memory_space<vmem>>, vector<1x32xf32>
    %86 = vector.broadcast %85 : vector<1x32xf32> to vector<8x32xf32>
    %87 = arith.addf %84, %86 : vector<8x32xf32>
    %88 = arith.addf %73, %87 : vector<8x32xf32>
    %c0_43 = arith.constant 0 : index
    %c0_44 = arith.constant 0 : index
    %89 = vector.load %arg16[%c0_43, %c0_44] : memref<1x32xf32, #tpu.memory_space<vmem>>, vector<1x32xf32>
    %c0_45 = arith.constant 0 : index
    %c0_46 = arith.constant 0 : index
    %90 = vector.load %arg17[%c0_45, %c0_46] : memref<1x32xf32, #tpu.memory_space<vmem>>, vector<1x32xf32>
    %cst_47 = arith.constant dense<0.000000e+00> : vector<8xf32>
    %91 = vector.multi_reduction <add>, %88, %cst_47 [1] : vector<8x32xf32> to vector<8xf32>
    %92 = vector.shape_cast %91 : vector<8xf32> to vector<8x1xf32>
    %cst_48 = arith.constant 3.200000e+01 : f32
    %93 = vector.broadcast %cst_48 : f32 to vector<8x1xf32>
    %94 = arith.divf %92, %93 : vector<8x1xf32>
    %95 = vector.broadcast %94 : vector<8x1xf32> to vector<8x32xf32>
    %96 = arith.subf %88, %95 : vector<8x32xf32>
    %97 = arith.mulf %96, %96 : vector<8x32xf32>
    %cst_49 = arith.constant dense<0.000000e+00> : vector<8xf32>
    %98 = vector.multi_reduction <add>, %97, %cst_49 [1] : vector<8x32xf32> to vector<8xf32>
    %99 = vector.shape_cast %98 : vector<8xf32> to vector<8x1xf32>
    %cst_50 = arith.constant 3.200000e+01 : f32
    %100 = vector.broadcast %cst_50 : f32 to vector<8x1xf32>
    %101 = arith.divf %99, %100 : vector<8x1xf32>
    %102 = vector.broadcast %94 : vector<8x1xf32> to vector<8x32xf32>
    %103 = arith.subf %88, %102 : vector<8x32xf32>
    %cst_51 = arith.constant 9.99999974E-6 : f32
    %104 = vector.broadcast %cst_51 : f32 to vector<8x1xf32>
    %105 = arith.addf %101, %104 : vector<8x1xf32>
    %106 = math.rsqrt %105 : vector<8x1xf32>
    %107 = vector.broadcast %106 : vector<8x1xf32> to vector<8x32xf32>
    %108 = arith.mulf %103, %107 : vector<8x32xf32>
    %109 = vector.broadcast %89 : vector<1x32xf32> to vector<8x32xf32>
    %110 = arith.mulf %108, %109 : vector<8x32xf32>
    %111 = vector.broadcast %90 : vector<1x32xf32> to vector<8x32xf32>
    %112 = arith.addf %110, %111 : vector<8x32xf32>
    %c0_52 = arith.constant 0 : index
    %c0_53 = arith.constant 0 : index
    %c0_54 = arith.constant 0 : index
    %113 = vector.load %arg18[%c0_52, %c0_53, %c0_54] : memref<1x8x32xf32, #tpu.memory_space<vmem>>, vector<1x8x32xf32>
    %114 = vector.shape_cast %113 : vector<1x8x32xf32> to vector<8x32xf32>
    %115 = vector.shape_cast %112 : vector<8x32xf32> to vector<1x8x32xf32>
    tpu.vector_store %arg18[%c0_52, %c0_53, %c0_54], %115 {strides = array<i32>} : memref<1x8x32xf32, #tpu.memory_space<vmem>>, vector<1x8x32xf32>,
    return
  }
  func.func @transform_0(%arg0: i32, %arg1: i32) -> (i32, i32, i32) {
    %c0_i32 = arith.constant 0 : i32
    %c0_i32_0 = arith.constant 0 : i32
    return %arg0, %arg1, %c0_i32 : i32, i32, i32
  }
  func.func @transform_1(%arg0: i32, %arg1: i32) -> (i32, i32, i32) {
    %c0_i32 = arith.constant 0 : i32
    %c0_i32_0 = arith.constant 0 : i32
    %c0_i32_1 = arith.constant 0 : i32
    return %arg0, %c0_i32, %c0_i32_0 : i32, i32, i32
  }
  func.func @transform_2(%arg0: i32, %arg1: i32) -> (i32, i32) {
    %c0_i32 = arith.constant 0 : i32
    %c0_i32_0 = arith.constant 0 : i32
    %c0_i32_1 = arith.constant 0 : i32
    return %c0_i32, %c0_i32_0 : i32, i32
  }
  func.func @transform_3(%arg0: i32, %arg1: i32) -> (i32, i32) {
    %c0_i32 = arith.constant 0 : i32
    %c0_i32_0 = arith.constant 0 : i32
    %c0_i32_1 = arith.constant 0 : i32
    return %c0_i32, %c0_i32_0 : i32, i32
  }
  func.func @transform_4(%arg0: i32, %arg1: i32) -> (i32, i32) {
    %c0_i32 = arith.constant 0 : i32
    %c0_i32_0 = arith.constant 0 : i32
    %c0_i32_1 = arith.constant 0 : i32
    return %c0_i32, %c0_i32_0 : i32, i32
  }
  func.func @transform_5(%arg0: i32, %arg1: i32) -> (i32, i32) {
    %c0_i32 = arith.constant 0 : i32
    %c0_i32_0 = arith.constant 0 : i32
    %c0_i32_1 = arith.constant 0 : i32
    return %c0_i32, %c0_i32_0 : i32, i32
  }
  func.func @transform_6(%arg0: i32, %arg1: i32) -> (i32, i32) {
    %c0_i32 = arith.constant 0 : i32
    %c0_i32_0 = arith.constant 0 : i32
    %c0_i32_1 = arith.constant 0 : i32
    return %c0_i32, %c0_i32_0 : i32, i32
  }
  func.func @transform_7(%arg0: i32, %arg1: i32) -> (i32, i32) {
    %c0_i32 = arith.constant 0 : i32
    %c0_i32_0 = arith.constant 0 : i32
    %c0_i32_1 = arith.constant 0 : i32
    return %c0_i32, %c0_i32_0 : i32, i32
  }
  func.func @transform_8(%arg0: i32, %arg1: i32) -> (i32, i32) {
    %c0_i32 = arith.constant 0 : i32
    %c0_i32_0 = arith.constant 0 : i32
    %c0_i32_1 = arith.constant 0 : i32
    return %c0_i32, %c0_i32_0 : i32, i32
  }
  func.func @transform_9(%arg0: i32, %arg1: i32) -> (i32, i32) {
    %c0_i32 = arith.constant 0 : i32
    %c0_i32_0 = arith.constant 0 : i32
    %c0_i32_1 = arith.constant 0 : i32
    return %c0_i32, %c0_i32_0 : i32, i32
  }
  func.func @transform_10(%arg0: i32, %arg1: i32) -> (i32, i32) {
    %c0_i32 = arith.constant 0 : i32
    %c0_i32_0 = arith.constant 0 : i32
    %c0_i32_1 = arith.constant 0 : i32
    return %c0_i32, %c0_i32_0 : i32, i32
  }
  func.func @transform_11(%arg0: i32, %arg1: i32) -> (i32, i32) {
    %c0_i32 = arith.constant 0 : i32
    %c0_i32_0 = arith.constant 0 : i32
    %c0_i32_1 = arith.constant 0 : i32
    return %c0_i32, %c0_i32_0 : i32, i32
  }
  func.func @transform_12(%arg0: i32, %arg1: i32) -> (i32, i32) {
    %c0_i32 = arith.constant 0 : i32
    %c0_i32_0 = arith.constant 0 : i32
    %c0_i32_1 = arith.constant 0 : i32
    return %c0_i32, %c0_i32_0 : i32, i32
  }
  func.func @transform_13(%arg0: i32, %arg1: i32) -> (i32, i32) {
    %c0_i32 = arith.constant 0 : i32
    %c0_i32_0 = arith.constant 0 : i32
    %c0_i32_1 = arith.constant 0 : i32
    return %c0_i32, %c0_i32_0 : i32, i32
  }
  func.func @transform_14(%arg0: i32, %arg1: i32) -> (i32, i32) {
    %c0_i32 = arith.constant 0 : i32
    %c0_i32_0 = arith.constant 0 : i32
    %c0_i32_1 = arith.constant 0 : i32
    return %c0_i32, %c0_i32_0 : i32, i32
  }
  func.func @transform_15(%arg0: i32, %arg1: i32) -> (i32, i32) {
    %c0_i32 = arith.constant 0 : i32
    %c0_i32_0 = arith.constant 0 : i32
    %c0_i32_1 = arith.constant 0 : i32
    return %c0_i32, %c0_i32_0 : i32, i32
  }
  func.func @transform_16(%arg0: i32, %arg1: i32) -> (i32, i32, i32) {
    %c0_i32 = arith.constant 0 : i32
    %c0_i32_0 = arith.constant 0 : i32
    return %arg0, %arg1, %c0_i32 : i32, i32, i32
  }
}

module attributes {stable_mosaic.version = 11 : i64} {
  func.func @transformer_block_kernel(%arg0: i32, %arg1: i32, %arg2: memref<1x8x32xf32, #tpu.memory_space<vmem>>, %arg3: memref<1x8x32xbf16, #tpu.memory_space<vmem>>, %arg4: memref<32x32xbf16, #tpu.memory_space<vmem>>, %arg5: memref<1x32xf32, #tpu.memory_space<vmem>>, %arg6: memref<32x64xbf16, #tpu.memory_space<vmem>>, %arg7: memref<1x64xf32, #tpu.memory_space<vmem>>, %arg8: memref<32x32xbf16, #tpu.memory_space<vmem>>, %arg9: memref<1x32xf32, #tpu.memory_space<vmem>>, %arg10: memref<1x32xf32, #tpu.memory_space<vmem>>, %arg11: memref<1x32xf32, #tpu.memory_space<vmem>>, %arg12: memref<32x64xbf16, #tpu.memory_space<vmem>>, %arg13: memref<1x64xf32, #tpu.memory_space<vmem>>, %arg14: memref<64x32xbf16, #tpu.memory_space<vmem>>, %arg15: memref<1x32xf32, #tpu.memory_space<vmem>>, %arg16: memref<1x32xf32, #tpu.memory_space<vmem>>, %arg17: memref<1x32xf32, #tpu.memory_space<vmem>>, %arg18: memref<1x8x32xf32, #tpu.memory_space<vmem>>, %arg19: memref<8x32xbf16, #tpu.memory_space<vmem>>, %arg20: memref<8x32xbf16, #tpu.memory_space<vmem>>) attributes {dimension_semantics = [#tpu.dimension_semantics<parallel>, #tpu.dimension_semantics<arbitrary>], iteration_bounds = array<i64: 2, 1>, scalar_prefetch = 0 : i64, scratch_operands = 2 : i64, tpu.core_type = #tpu.core_type<tc>, window_params = [{transform_indices = @transform_0, window_bounds = array<i64: 1, 8, 32>}, {transform_indices = @transform_1, window_bounds = array<i64: 1, 8, 32>}, {pipeline_mode = #tpu.pipeline_mode<synchronous>, transform_indices = @transform_2, window_bounds = array<i64: 32, 32>}, {pipeline_mode = #tpu.pipeline_mode<synchronous>, transform_indices = @transform_3, window_bounds = array<i64: 1, 32>}, {pipeline_mode = #tpu.pipeline_mode<synchronous>, transform_indices = @transform_4, window_bounds = array<i64: 32, 64>}, {pipeline_mode = #tpu.pipeline_mode<synchronous>, transform_indices = @transform_5, window_bounds = array<i64: 1, 64>}, {pipeline_mode = #tpu.pipeline_mode<synchronous>, transform_indices = @transform_6, window_bounds = array<i64: 32, 32>}, {pipeline_mode = #tpu.pipeline_mode<synchronous>, transform_indices = @transform_7, window_bounds = array<i64: 1, 32>}, {pipeline_mode = #tpu.pipeline_mode<synchronous>, transform_indices = @transform_8, window_bounds = array<i64: 1, 32>}, {pipeline_mode = #tpu.pipeline_mode<synchronous>, transform_indices = @transform_9, window_bounds = array<i64: 1, 32>}, {pipeline_mode = #tpu.pipeline_mode<synchronous>, transform_indices = @transform_10, window_bounds = array<i64: 32, 64>}, {pipeline_mode = #tpu.pipeline_mode<synchronous>, transform_indices = @transform_11, window_bounds = array<i64: 1, 64>}, {pipeline_mode = #tpu.pipeline_mode<synchronous>, transform_indices = @transform_12, window_bounds = array<i64: 64, 32>}, {pipeline_mode = #tpu.pipeline_mode<synchronous>, transform_indices = @transform_13, window_bounds = array<i64: 1, 32>}, {pipeline_mode = #tpu.pipeline_mode<synchronous>, transform_indices = @transform_14, window_bounds = array<i64: 1, 32>}, {pipeline_mode = #tpu.pipeline_mode<synchronous>, transform_indices = @transform_15, window_bounds = array<i64: 1, 32>}, {transform_indices = @transform_16, window_bounds = array<i64: 1, 8, 32>}]} {
    %c0 = arith.constant 0 : index
    %c0_0 = arith.constant 0 : index
    %c0_1 = arith.constant 0 : index
    %0 = vector.load %arg2[%c0, %c0_0, %c0_1] : memref<1x8x32xf32, #tpu.memory_space<vmem>>, vector<1x8x32xf32>
    %1 = vector.shape_cast %0 : vector<1x8x32xf32> to vector<8x32xf32>
    %c0_i32 = arith.constant 0 : i32
    %2 = arith.cmpi eq, %arg1, %c0_i32 : i32
    %3 = arith.extui %2 : i1 to i32
    %c0_i32_2 = arith.constant 0 : i32
    %4 = arith.cmpi ne, %3, %c0_i32_2 : i32
    scf.if %4 {
      %c0_55 = arith.constant 0 : index
      %c0_56 = arith.constant 0 : index
      %c0_57 = arith.constant 0 : index
      %116 = vector.load %arg3[%c0_55, %c0_56, %c0_57] : memref<1x8x32xbf16, #tpu.memory_space<vmem>>, vector<1x8x32xbf16>
      %117 = vector.shape_cast %116 : vector<1x8x32xbf16> to vector<8x32xbf16>
      %c0_58 = arith.constant 0 : index
      %c0_59 = arith.constant 0 : index
      %118 = vector.load %arg6[%c0_58, %c0_59] : memref<32x64xbf16, #tpu.memory_space<vmem>>, vector<32x64xbf16>
      %cst_60 = arith.constant dense<0.000000e+00> : vector<8x64xf32>
      %119 = tpu.matmul %117, %118, %cst_60 {dimension_numbers = #tpu.dot_dimension_numbers<[1], [0], [0], [1], [0, 0, 1, 1], [], []>} : vector<8x32xbf16>, vector<32x64xbf16>, vector<8x64xf32> -> vector<8x64xf32>
      %c0_61 = arith.constant 0 : index
      %c0_62 = arith.constant 0 : index
      %120 = vector.load %arg7[%c0_61, %c0_62] : memref<1x64xf32, #tpu.memory_space<vmem>>, vector<1x64xf32>
      %121 = vector.broadcast %120 : vector<1x64xf32> to vector<8x64xf32>
      %122 = arith.addf %119, %121 : vector<8x64xf32>
      %123 = vector.extract_strided_slice %122 {offsets = [0, 0], sizes = [8, 32], strides = [1, 1]} : vector<8x64xf32> to vector<8x32xf32>
      %124 = arith.truncf %123 : vector<8x32xf32> to vector<8x32xbf16>
      %c0_63 = arith.constant 0 : index
      %c0_64 = arith.constant 0 : index
      %125 = vector.load %arg19[%c0_63, %c0_64] : memref<8x32xbf16, #tpu.memory_space<vmem>>, vector<8x32xbf16>
      tpu.vector_store %arg19[%c0_63, %c0_64], %124 {strides = array<i32>} : memref<8x32xbf16, #tpu.memory_space<vmem>>, vector<8x32xbf16>,
      %126 = vector.extract_strided_slice %122 {offsets = [0, 32], sizes = [8, 32], strides = [1, 1]} : vector<8x64xf32> to vector<8x32xf32>
      %127 = arith.truncf %126 : vector<8x32xf32> to vector<8x32xbf16>
      %c0_65 = arith.constant 0 : index
      %c0_66 = arith.constant 0 : index
      %128 = vector.load %arg20[%c0_65, %c0_66] : memref<8x32xbf16, #tpu.memory_space<vmem>>, vector<8x32xbf16>
      tpu.vector_store %arg20[%c0_65, %c0_66], %127 {strides = array<i32>} : memref<8x32xbf16, #tpu.memory_space<vmem>>, vector<8x32xbf16>,
    } else {
    }
    %5 = arith.truncf %1 : vector<8x32xf32> to vector<8x32xbf16>
    %c0_3 = arith.constant 0 : index
    %c0_4 = arith.constant 0 : index
    %6 = vector.load %arg4[%c0_3, %c0_4] : memref<32x32xbf16, #tpu.memory_space<vmem>>, vector<32x32xbf16>
    %cst = arith.constant dense<0.000000e+00> : vector<8x32xf32>
    %7 = tpu.matmul %5, %6, %cst {dimension_numbers = #tpu.dot_dimension_numbers<[1], [0], [0], [1], [0, 0, 1, 1], [], []>} : vector<8x32xbf16>, vector<32x32xbf16>, vector<8x32xf32> -> vector<8x32xf32>
    %c0_5 = arith.constant 0 : index
    %c0_6 = arith.constant 0 : index
    %8 = vector.load %arg5[%c0_5, %c0_6] : memref<1x32xf32, #tpu.memory_space<vmem>>, vector<1x32xf32>
    %9 = vector.broadcast %8 : vector<1x32xf32> to vector<8x32xf32>
    %10 = arith.addf %7, %9 : vector<8x32xf32>
    %11 = vector.shape_cast %10 : vector<8x32xf32> to vector<8x4x8xf32>
    %12 = arith.truncf %11 : vector<8x4x8xf32> to vector<8x4x8xbf16>
    %cst_7 = arith.constant 0xFF800000 : f32
    %13 = vector.broadcast %cst_7 : f32 to vector<4x8x1xf32>
    %cst_8 = arith.constant 0.000000e+00 : f32
    %14 = vector.broadcast %cst_8 : f32 to vector<4x8x1xf32>
    %cst_9 = arith.constant 0.000000e+00 : f32
    %15 = vector.broadcast %cst_9 : f32 to vector<4x8x8xf32>
    %c0_10 = arith.constant 0 : index
    %c0_11 = arith.constant 0 : index
    %16 = vector.load %arg19[%c0_10, %c0_11] : memref<8x32xbf16, #tpu.memory_space<vmem>>, vector<8x32xbf16>
    %17 = vector.shape_cast %16 : vector<8x32xbf16> to vector<8x4x8xbf16>
    %c0_12 = arith.constant 0 : index
    %c0_13 = arith.constant 0 : index
    %18 = vector.load %arg20[%c0_12, %c0_13] : memref<8x32xbf16, #tpu.memory_space<vmem>>, vector<8x32xbf16>
    %19 = vector.shape_cast %18 : vector<8x32xbf16> to vector<8x4x8xbf16>
    "tpu.trace_start"() <{level = 10 : i32, message = "qhd,khd->hqk"}> : () -> ()
    %cst_14 = arith.constant dense<0.000000e+00> : vector<4x8x8xf32>
    %20 = tpu.matmul %12, %17, %cst_14 {dimension_numbers = #tpu.dot_dimension_numbers<[2], [2], [0], [0], [0, 1, 0, 0, 1, 0], [1], [1]>} : vector<8x4x8xbf16>, vector<8x4x8xbf16>, vector<4x8x8xf32> -> vector<4x8x8xf32>
    "tpu.trace_stop"() : () -> ()
    %cst_15 = arith.constant dense<0xFF800000> : vector<4x8xf32>
    %21 = vector.multi_reduction <maximumf>, %20, %cst_15 [2] : vector<4x8x8xf32> to vector<4x8xf32>
    %22 = vector.shape_cast %21 : vector<4x8xf32> to vector<4x8x1xf32>
    %23 = arith.maximumf %13, %22 : vector<4x8x1xf32>
    %24 = arith.subf %13, %23 : vector<4x8x1xf32>
    %25 = math.exp %24 : vector<4x8x1xf32>
    %26 = vector.broadcast %23 : vector<4x8x1xf32> to vector<4x8x8xf32>
    %27 = arith.subf %20, %26 : vector<4x8x8xf32>
    %28 = math.exp %27 : vector<4x8x8xf32>
    %29 = arith.mulf %25, %14 : vector<4x8x1xf32>
    %cst_16 = arith.constant dense<0.000000e+00> : vector<4x8xf32>
    %30 = vector.multi_reduction <add>, %28, %cst_16 [2] : vector<4x8x8xf32> to vector<4x8xf32>
    %31 = vector.shape_cast %30 : vector<4x8xf32> to vector<4x8x1xf32>
    %32 = arith.addf %29, %31 : vector<4x8x1xf32>
    %33 = vector.broadcast %25 : vector<4x8x1xf32> to vector<4x8x8xf32>
    %34 = arith.mulf %33, %15 : vector<4x8x8xf32>
    %35 = arith.truncf %28 : vector<4x8x8xf32> to vector<4x8x8xbf16>
    "tpu.trace_start"() <{level = 10 : i32, message = "hqk,khd->hqd"}> : () -> ()
    %cst_17 = arith.constant dense<0.000000e+00> : vector<4x8x8xf32>
    %36 = tpu.matmul %35, %19, %cst_17 {dimension_numbers = #tpu.dot_dimension_numbers<[2], [0], [1], [2], [0, 0, 0, 1, 1, 2], [0], [1]>} : vector<4x8x8xbf16>, vector<8x4x8xbf16>, vector<4x8x8xf32> -> vector<4x8x8xf32>
    "tpu.trace_stop"() : () -> ()
    %37 = arith.addf %34, %36 : vector<4x8x8xf32>
    %38 = tpu.reciprocal %32 {approx = true} : vector<4x8x1xf32> -> vector<4x8x1xf32>
    %39 = vector.broadcast %38 : vector<4x8x1xf32> to vector<4x8x8xf32>
    %40 = arith.mulf %37, %39 : vector<4x8x8xf32>
    %41 = tpu.transpose %40, [1, 0, 2] : vector<4x8x8xf32> -> vector<8x4x8xf32>
    %42 = vector.shape_cast %41 : vector<8x4x8xf32> to vector<8x32xf32>
    %43 = arith.truncf %42 : vector<8x32xf32> to vector<8x32xbf16>
    %c0_18 = arith.constant 0 : index
    %c0_19 = arith.constant 0 : index
    %44 = vector.load %arg8[%c0_18, %c0_19] : memref<32x32xbf16, #tpu.memory_space<vmem>>, vector<32x32xbf16>
    %cst_20 = arith.constant dense<0.000000e+00> : vector<8x32xf32>
    %45 = tpu.matmul %43, %44, %cst_20 {dimension_numbers = #tpu.dot_dimension_numbers<[1], [0], [0], [1], [0, 0, 1, 1], [], []>} : vector<8x32xbf16>, vector<32x32xbf16>, vector<8x32xf32> -> vector<8x32xf32>
    %c0_21 = arith.constant 0 : index
    %c0_22 = arith.constant 0 : index
    %46 = vector.load %arg9[%c0_21, %c0_22] : memref<1x32xf32, #tpu.memory_space<vmem>>, vector<1x32xf32>
    %47 = vector.broadcast %46 : vector<1x32xf32> to vector<8x32xf32>
    %48 = arith.addf %45, %47 : vector<8x32xf32>
    %49 = arith.addf %1, %48 : vector<8x32xf32>
    %c0_23 = arith.constant 0 : index
    %c0_24 = arith.constant 0 : index
    %50 = vector.load %arg10[%c0_23, %c0_24] : memref<1x32xf32, #tpu.memory_space<vmem>>, vector<1x32xf32>
    %c0_25 = arith.constant 0 : index
    %c0_26 = arith.constant 0 : index
    %51 = vector.load %arg11[%c0_25, %c0_26] : memref<1x32xf32, #tpu.memory_space<vmem>>, vector<1x32xf32>
    %cst_27 = arith.constant dense<0.000000e+00> : vector<8xf32>
    %52 = vector.multi_reduction <add>, %49, %cst_27 [1] : vector<8x32xf32> to vector<8xf32>
    %53 = vector.shape_cast %52 : vector<8xf32> to vector<8x1xf32>
    %cst_28 = arith.constant 3.200000e+01 : f32
    %54 = vector.broadcast %cst_28 : f32 to vector<8x1xf32>
    %55 = arith.divf %53, %54 : vector<8x1xf32>
    %56 = vector.broadcast %55 : vector<8x1xf32> to vector<8x32xf32>
    %57 = arith.subf %49, %56 : vector<8x32xf32>
    %58 = arith.mulf %57, %57 : vector<8x32xf32>
    %cst_29 = arith.constant dense<0.000000e+00> : vector<8xf32>
    %59 = vector.multi_reduction <add>, %58, %cst_29 [1] : vector<8x32xf32> to vector<8xf32>
    %60 = vector.shape_cast %59 : vector<8xf32> to vector<8x1xf32>
    %cst_30 = arith.constant 3.200000e+01 : f32
    %61 = vector.broadcast %cst_30 : f32 to vector<8x1xf32>
    %62 = arith.divf %60, %61 : vector<8x1xf32>
    %63 = vector.broadcast %55 : vector<8x1xf32> to vector<8x32xf32>
    %64 = arith.subf %49, %63 : vector<8x32xf32>
    %cst_31 = arith.constant 9.99999974E-6 : f32
    %65 = vector.broadcast %cst_31 : f32 to vector<8x1xf32>
    %66 = arith.addf %62, %65 : vector<8x1xf32>
    %67 = math.rsqrt %66 : vector<8x1xf32>
    %68 = vector.broadcast %67 : vector<8x1xf32> to vector<8x32xf32>
    %69 = arith.mulf %64, %68 : vector<8x32xf32>
    %70 = vector.broadcast %50 : vector<1x32xf32> to vector<8x32xf32>
    %71 = arith.mulf %69, %70 : vector<8x32xf32>
    %72 = vector.broadcast %51 : vector<1x32xf32> to vector<8x32xf32>
    %73 = arith.addf %71, %72 : vector<8x32xf32>
    %74 = arith.truncf %73 : vector<8x32xf32> to vector<8x32xbf16>
    %c0_32 = arith.constant 0 : index
    %c0_33 = arith.constant 0 : index
    %75 = vector.load %arg12[%c0_32, %c0_33] : memref<32x64xbf16, #tpu.memory_space<vmem>>, vector<32x64xbf16>
    %cst_34 = arith.constant dense<0.000000e+00> : vector<8x64xf32>
    %76 = tpu.matmul %74, %75, %cst_34 {dimension_numbers = #tpu.dot_dimension_numbers<[1], [0], [0], [1], [0, 0, 1, 1], [], []>} : vector<8x32xbf16>, vector<32x64xbf16>, vector<8x64xf32> -> vector<8x64xf32>
    %c0_35 = arith.constant 0 : index
    %c0_36 = arith.constant 0 : index
    %77 = vector.load %arg13[%c0_35, %c0_36] : memref<1x64xf32, #tpu.memory_space<vmem>>, vector<1x64xf32>
    %78 = vector.broadcast %77 : vector<1x64xf32> to vector<8x64xf32>
    %79 = arith.addf %76, %78 : vector<8x64xf32>
    %cst_37 = arith.constant 0.000000e+00 : f32
    %80 = vector.broadcast %cst_37 : f32 to vector<8x64xf32>
    %81 = arith.maximumf %79, %80 : vector<8x64xf32>
    %82 = arith.truncf %81 : vector<8x64xf32> to vector<8x64xbf16>
    %c0_38 = arith.constant 0 : index
    %c0_39 = arith.constant 0 : index
    %83 = vector.load %arg14[%c0_38, %c0_39] : memref<64x32xbf16, #tpu.memory_space<vmem>>, vector<64x32xbf16>
    %cst_40 = arith.constant dense<0.000000e+00> : vector<8x32xf32>
    %84 = tpu.matmul %82, %83, %cst_40 {dimension_numbers = #tpu.dot_dimension_numbers<[1], [0], [0], [1], [0, 0, 1, 1], [], []>} : vector<8x64xbf16>, vector<64x32xbf16>, vector<8x32xf32> -> vector<8x32xf32>
    %c0_41 = arith.constant 0 : index
    %c0_42 = arith.constant 0 : index
    %85 = vector.load %arg15[%c0_41, %c0_42] : memref<1x32xf32, #tpu.memory_space<vmem>>, vector<1x32xf32>
    %86 = vector.broadcast %85 : vector<1x32xf32> to vector<8x32xf32>
    %87 = arith.addf %84, %86 : vector<8x32xf32>
    %88 = arith.addf %73, %87 : vector<8x32xf32>
    %c0_43 = arith.constant 0 : index
    %c0_44 = arith.constant 0 : index
    %89 = vector.load %arg16[%c0_43, %c0_44] : memref<1x32xf32, #tpu.memory_space<vmem>>, vector<1x32xf32>
    %c0_45 = arith.constant 0 : index
    %c0_46 = arith.constant 0 : index
    %90 = vector.load %arg17[%c0_45, %c0_46] : memref<1x32xf32, #tpu.memory_space<vmem>>, vector<1x32xf32>
    %cst_47 = arith.constant dense<0.000000e+00> : vector<8xf32>
    %91 = vector.multi_reduction <add>, %88, %cst_47 [1] : vector<8x32xf32> to vector<8xf32>
    %92 = vector.shape_cast %91 : vector<8xf32> to vector<8x1xf32>
    %cst_48 = arith.constant 3.200000e+01 : f32
    %93 = vector.broadcast %cst_48 : f32 to vector<8x1xf32>
    %94 = arith.divf %92, %93 : vector<8x1xf32>
    %95 = vector.broadcast %94 : vector<8x1xf32> to vector<8x32xf32>
    %96 = arith.subf %88, %95 : vector<8x32xf32>
    %97 = arith.mulf %96, %96 : vector<8x32xf32>
    %cst_49 = arith.constant dense<0.000000e+00> : vector<8xf32>
    %98 = vector.multi_reduction <add>, %97, %cst_49 [1] : vector<8x32xf32> to vector<8xf32>
    %99 = vector.shape_cast %98 : vector<8xf32> to vector<8x1xf32>
    %cst_50 = arith.constant 3.200000e+01 : f32
    %100 = vector.broadcast %cst_50 : f32 to vector<8x1xf32>
    %101 = arith.divf %99, %100 : vector<8x1xf32>
    %102 = vector.broadcast %94 : vector<8x1xf32> to vector<8x32xf32>
    %103 = arith.subf %88, %102 : vector<8x32xf32>
    %cst_51 = arith.constant 9.99999974E-6 : f32
    %104 = vector.broadcast %cst_51 : f32 to vector<8x1xf32>
    %105 = arith.addf %101, %104 : vector<8x1xf32>
    %106 = math.rsqrt %105 : vector<8x1xf32>
    %107 = vector.broadcast %106 : vector<8x1xf32> to vector<8x32xf32>
    %108 = arith.mulf %103, %107 : vector<8x32xf32>
    %109 = vector.broadcast %89 : vector<1x32xf32> to vector<8x32xf32>
    %110 = arith.mulf %108, %109 : vector<8x32xf32>
    %111 = vector.broadcast %90 : vector<1x32xf32> to vector<8x32xf32>
    %112 = arith.addf %110, %111 : vector<8x32xf32>
    %c0_52 = arith.constant 0 : index
    %c0_53 = arith.constant 0 : index
    %c0_54 = arith.constant 0 : index
    %113 = vector.load %arg18[%c0_52, %c0_53, %c0_54] : memref<1x8x32xf32, #tpu.memory_space<vmem>>, vector<1x8x32xf32>
    %114 = vector.shape_cast %113 : vector<1x8x32xf32> to vector<8x32xf32>
    %115 = vector.shape_cast %112 : vector<8x32xf32> to vector<1x8x32xf32>
    tpu.vector_store %arg18[%c0_52, %c0_53, %c0_54], %115 {strides = array<i32>} : memref<1x8x32xf32, #tpu.memory_space<vmem>>, vector<1x8x32xf32>,
    return
  }
  func.func @transform_0(%arg0: i32, %arg1: i32) -> (i32, i32, i32) {
    %c0_i32 = arith.constant 0 : i32
    %c0_i32_0 = arith.constant 0 : i32
    return %arg0, %arg1, %c0_i32 : i32, i32, i32
  }
  func.func @transform_1(%arg0: i32, %arg1: i32) -> (i32, i32, i32) {
    %c0_i32 = arith.constant 0 : i32
    %c0_i32_0 = arith.constant 0 : i32
    %c0_i32_1 = arith.constant 0 : i32
    return %arg0, %c0_i32, %c0_i32_0 : i32, i32, i32
  }
  func.func @transform_2(%arg0: i32, %arg1: i32) -> (i32, i32) {
    %c0_i32 = arith.constant 0 : i32
    %c0_i32_0 = arith.constant 0 : i32
    %c0_i32_1 = arith.constant 0 : i32
    return %c0_i32, %c0_i32_0 : i32, i32
  }
  func.func @transform_3(%arg0: i32, %arg1: i32) -> (i32, i32) {
    %c0_i32 = arith.constant 0 : i32
    %c0_i32_0 = arith.constant 0 : i32
    %c0_i32_1 = arith.constant 0 : i32
    return %c0_i32, %c0_i32_0 : i32, i32
  }
  func.func @transform_4(%arg0: i32, %arg1: i32) -> (i32, i32) {
    %c0_i32 = arith.constant 0 : i32
    %c0_i32_0 = arith.constant 0 : i32
    %c0_i32_1 = arith.constant 0 : i32
    return %c0_i32, %c0_i32_0 : i32, i32
  }
  func.func @transform_5(%arg0: i32, %arg1: i32) -> (i32, i32) {
    %c0_i32 = arith.constant 0 : i32
    %c0_i32_0 = arith.constant 0 : i32
    %c0_i32_1 = arith.constant 0 : i32
    return %c0_i32, %c0_i32_0 : i32, i32
  }
  func.func @transform_6(%arg0: i32, %arg1: i32) -> (i32, i32) {
    %c0_i32 = arith.constant 0 : i32
    %c0_i32_0 = arith.constant 0 : i32
    %c0_i32_1 = arith.constant 0 : i32
    return %c0_i32, %c0_i32_0 : i32, i32
  }
  func.func @transform_7(%arg0: i32, %arg1: i32) -> (i32, i32) {
    %c0_i32 = arith.constant 0 : i32
    %c0_i32_0 = arith.constant 0 : i32
    %c0_i32_1 = arith.constant 0 : i32
    return %c0_i32, %c0_i32_0 : i32, i32
  }
  func.func @transform_8(%arg0: i32, %arg1: i32) -> (i32, i32) {
    %c0_i32 = arith.constant 0 : i32
    %c0_i32_0 = arith.constant 0 : i32
    %c0_i32_1 = arith.constant 0 : i32
    return %c0_i32, %c0_i32_0 : i32, i32
  }
  func.func @transform_9(%arg0: i32, %arg1: i32) -> (i32, i32) {
    %c0_i32 = arith.constant 0 : i32
    %c0_i32_0 = arith.constant 0 : i32
    %c0_i32_1 = arith.constant 0 : i32
    return %c0_i32, %c0_i32_0 : i32, i32
  }
  func.func @transform_10(%arg0: i32, %arg1: i32) -> (i32, i32) {
    %c0_i32 = arith.constant 0 : i32
    %c0_i32_0 = arith.constant 0 : i32
    %c0_i32_1 = arith.constant 0 : i32
    return %c0_i32, %c0_i32_0 : i32, i32
  }
  func.func @transform_11(%arg0: i32, %arg1: i32) -> (i32, i32) {
    %c0_i32 = arith.constant 0 : i32
    %c0_i32_0 = arith.constant 0 : i32
    %c0_i32_1 = arith.constant 0 : i32
    return %c0_i32, %c0_i32_0 : i32, i32
  }
  func.func @transform_12(%arg0: i32, %arg1: i32) -> (i32, i32) {
    %c0_i32 = arith.constant 0 : i32
    %c0_i32_0 = arith.constant 0 : i32
    %c0_i32_1 = arith.constant 0 : i32
    return %c0_i32, %c0_i32_0 : i32, i32
  }
  func.func @transform_13(%arg0: i32, %arg1: i32) -> (i32, i32) {
    %c0_i32 = arith.constant 0 : i32
    %c0_i32_0 = arith.constant 0 : i32
    %c0_i32_1 = arith.constant 0 : i32
    return %c0_i32, %c0_i32_0 : i32, i32
  }
  func.func @transform_14(%arg0: i32, %arg1: i32) -> (i32, i32) {
    %c0_i32 = arith.constant 0 : i32
    %c0_i32_0 = arith.constant 0 : i32
    %c0_i32_1 = arith.constant 0 : i32
    return %c0_i32, %c0_i32_0 : i32, i32
  }
  func.func @transform_15(%arg0: i32, %arg1: i32) -> (i32, i32) {
    %c0_i32 = arith.constant 0 : i32
    %c0_i32_0 = arith.constant 0 : i32
    %c0_i32_1 = arith.constant 0 : i32
    return %c0_i32, %c0_i32_0 : i32, i32
  }
  func.func @transform_16(%arg0: i32, %arg1: i32) -> (i32, i32, i32) {
    %c0_i32 = arith.constant 0 : i32
    %c0_i32_0 = arith.constant 0 : i32
    return %arg0, %arg1, %c0_i32 : i32, i32, i32
  }
}

</mosaic_0001>

<bundles_post_ra>
// kernel: tpu_custom_call.1
= control target key start
LH: loop header
LB: loop body
LE: loop exit
PB: predicated region body
PF: predicated region fallthrough
CT: control target
= control target key end

     0   :  { %s2442_s0 = inlined_call_operand.vmem [shape: f32[2,8,32], index: 0, kind: input, shape index: {}]   ;;  %s2443_s1 = inlined_call_operand.hbm [shape: bf16[2,8,32], index: 1, kind: input, shape index: {}]   ;;  %s2444_s2 = inlined_call_operand.vmem [shape: bf16[32,32], index: 2, kind: input, shape index: {}]   ;;  %s2445_s3 = inlined_call_operand.vmem [shape: f32[1,32], index: 3, kind: input, shape index: {}]   ;;  %s2446_s4 = inlined_call_operand.vmem [shape: bf16[32,64], index: 4, kind: input, shape index: {}]   ;;  %s2447_s5 = inlined_call_operand.vmem [shape: f32[1,64], index: 5, kind: input, shape index: {}]   ;;  %s2448_s6 = inlined_call_operand.hbm [shape: bf16[32,32], index: 6, kind: input, shape index: {}]   ;;  %s2449_s7 = inlined_call_operand.vmem [shape: f32[1,32], index: 7, kind: input, shape index: {}]   ;;  %s2450_s8 = inlined_call_operand.vmem [shape: f32[1,32], index: 8, kind: input, shape index: {}]   ;;  %s2451_s9 = inlined_call_operand.vmem [shape: f32[1,32], index: 9, kind: input, shape index: {}]   ;;  %s2452_s10 = inlined_call_operand.hbm [shape: bf16[32,64], index: 10, kind: input, shape index: {}]   ;;  %s2453_s11 = inlined_call_operand.vmem [shape: f32[1,64], index: 11, kind: input, shape index: {}]   ;;  %s2454_s12 = inlined_call_operand.vmem [shape: bf16[64,32], index: 12, kind: input, shape index: {}]   ;;  %s2455_s13 = inlined_call_operand.vmem [shape: f32[1,32], index: 13, kind: input, shape index: {}]   ;;  %s2456_s14 = inlined_call_operand.vmem [shape: f32[1,32], index: 14, kind: input, shape index: {}]   ;;  %s2457_s15 = inlined_call_operand.vmem [shape: f32[1,32], index: 15, kind: input, shape index: {}]   ;;  %s2458_s16 = inlined_call_operand.hbm [shape: f32[2,8,32], index: 16, kind: output, shape index: {}]  }
   0x1   :  { %2464 = sst [smem:[#allocation17_spill]] %s2442_s0 }
   0x2   :  { %2465 = sst [smem:[#allocation18_spill]] %s2443_s1 }
   0x3   :  { %2466 = sst [smem:[#allocation19_spill]] %s2448_s6 }
   0x4   :  { %2467 = sst [smem:[#allocation20_spill]] %s2452_s10 }
   0x5   :  { %2468 = sst [smem:[#allocation21_spill]] %s2453_s11 }
   0x6   :  { %2469 = sst [smem:[#allocation22_spill]] %s2455_s13 }
   0x7   :  { %2470 = sst [smem:[#allocation23_spill]] %s2456_s14 }
   0x8   :  { %2471 = sst [smem:[#allocation24_spill]] %s2457_s15 }
   0x9   :  { %2472 = sst [smem:[#allocation25_spill]] %s2458_s16 }
   0xa   :  { %21 = vsyncpa [#allocation5], 0 }
   0xb   :  { %23 = vsyncpa [#allocation5 + $0x1], 0 }
   0xc   :  { %24 = vsyncpa [#allocation8], 0 }
   0xd   :  { %25 = vsyncpa [#allocation6], 0 }
   0xe   :  { %27 = vsyncpa [#allocation6 + $0x1], 0  ;;  %s2110_s21 = smov 0   ;;  %s2112_s22 = smov 0  }
   0xf   :  { %s2114_s23 = smov 0   ;;  %s2116_s24 = smov 0  }
  0x10   :  { %s2118_s25 = smov 0   ;;  %s2120_s26 = smov 0  }
  0x11 LB: > { %2473 = sst [smem:[#allocation14_spill]] %s1989_s21  ;;  %s2459_s27 = sadd.s32 4294967295, %s2009_s26   ;;  %s2009_s26 = sphi %s2120_s26, %s33_s26   ;;  %s2005_s25 = sphi %s2118_s25, %s2493_s25   ;;  %s2001_s24 = sphi %s2116_s24, %s2492_s24   ;;  %s1997_s23 = sphi %s2114_s23, %s2496_s23   ;;  %s1993_s22 = sphi %s2112_s22, %s2495_s22   ;;  %s1989_s21 = sphi %s2110_s21, %s2494_s21  }
  0x12   : > { %2474 = sst [smem:[#allocation15_spill]] %s2005_s25  ;;  %p1603_p0 = scmp.ge.s32.totalorder %s2009_s26, 1 }
  0x13   : > { %p2144_p1 = scmp.eq.s32.totalorder %s2459_s27, 0  ;;  %p426_p2 = scmp.lt.s32.totalorder %s2009_s26, 3 }
  0x14   : > { %s2476_s6 = sld [smem:[#allocation19_spill]]  ;;  %s2011_s18 = smov [#allocation7]  }
  0x15   : > { %p2152_p3 = pnand %p1603_p0, %p426_p2  ;;  %s451_s19 = sshll.u32 %s2011_s18, 4  ;;  %s452_s19 = int_to_ptr.vmem [resolvable:$true] %s451_s19 }
  0x16   : > { %p1606_p6 = scmp.ge.s32.totalorder %s2009_s26, 2  ;;  %s2478_s10 = sld [smem:[#allocation20_spill]] }
  0x17   : > { %p1704_p4 = pneg %p2152_p3  ;;  %s2012_s27 = smov 64  }
  0x18   : > { %s2014_s18 = smov [#allocation9]   ;;  %s45_s16 = sadd.s32 1, %s2005_s25 }
  0x19   : > { %p1705_p5 = pnand %p1704_p4, %p2144_p1  ;;  %s474_s15 = sshll.u32 %s2014_s18, 4  ;;  %s475_s15 = int_to_ptr.vmem [resolvable:$true] %s474_s15 }
  0x1a   : > { %s449_s0 = sshll.u32 %s2476_s6, 4  ;;  %s2013_s6 = smov 4   ;;  %s450_s0 = int_to_ptr.hbm [resolvable:$true] %s449_s0 }
  0x1b   : > { %1707 = dma.hbm_to_vmem [thread:$0]  (!%p1705_p5), %s450_s0, 256, %s452_s19, [#allocation8], %s2012_s27, %s2012_s27, %s2013_s6  }
  0x1c   : > { %s472_s30 = sshll.u32 %s2478_s10, 4  ;;  %s1602_s14 = sadd.s32 4294967294, %s2009_s26   ;;  %s473_s30 = int_to_ptr.hbm [resolvable:$true] %s472_s30 }
  0x1d   : > { %1710 = dma.hbm_to_vmem [thread:$0]  (!%p1705_p5), %s473_s30, 256, %s475_s15, [#allocation8], %s2012_s27, %s2012_s27, %s2013_s6  }
  0x1e   : > { %p47_p7 = scmp.ge.s32.totalorder %s45_s16, 2  ;;  %s80_s20 = sadd.s32 1, %s1997_s23 }
  0x1f   : > { %p87_p8 = scmp.ne.s32.totalorder %s1997_s23, %s1993_s22  ;;  %p88_p9 = scmp.eq.s32.totalorder %s2009_s26, 0 }
  0x20   : > { %s2498_s16 = smov (%p47_p7, %s45_s16), 0  ;;  %p93_p10 = scmp.ne.s32.totalorder %s1993_s22, %s1989_s21 }
  0x21   : > { %2479 = sst [smem:[#allocation16_spill]] %s2498_s16  ;;  %s77_s0 = ssub.s32 %s2005_s25, %s2498_s16 }
  0x22   : > { %s2480_s19 = sadd.s32 4294967295, %s2009_s26   ;;  %p78_p12 = scmp.eq.s32.totalorder %s77_s0, 0 }
  0x23   : > { %p413_p11 = scmp.eq.s32.totalorder %s2480_s19, 1  ;;  %p2180_p13 = por %p2144_p1, %p93_p10 }
  0x24   : > { %p419_p2 = scmp.eq.s32.totalorder %s1602_s14, 1  ;;  %p89_p4 = por %p88_p9, %p87_p8 }
  0x25   : > { %p2184_p0 = por %p413_p11, %p87_p8  ;;  %s513_s30 = sand.u32 1, %s1997_s23  }
  0x26   : > { %s2189_s27 = scalar_select %p78_p12, %s1997_s23, %s80_s20  }
  0x27   : > { %p2191_p5 = por %p419_p2, %p93_p10  ;;  %s1608_s18 = sshll.u32 %s2005_s25, 2 }
  0x28   : > { %p1721_p7 = scmp.lt.s32.totalorder %s2009_s26, 2  ;;  %s1607_s0 = sshll.u32 %s513_s30, 2 }
  0x29   : > { %s2484_s1 = sld [smem:[#allocation18_spill]]  ;;  %s517_s13 = scalar_lea.vmem [#allocation4], %s1607_s0 }
  0x2a   : > { %s525_s11 = sshll.u32 %s517_s13, 4  ;;  %p1712_p11 = pnand %p1721_p7, %p89_p4  ;;  %s526_s11 = int_to_ptr.vmem [resolvable:$true] %s525_s11 }
  0x2b   : > { %s514_s14 = scalar_lea.sflag [#allocation5], %s513_s30  ;;  %s2204_s20 = sand.u32 (!%p2152_p3), 1, %s1993_s22  }
  0x2c   : > { %s1610_s25 = sshll.u32 (!%p2152_p3), %s2204_s20, 2  ;;  %s537_s10 = scalar_lea.sflag (!%p2152_p3), [#allocation5], %s2204_s20 }
  0x2d   : > { %534 = sbr.rel (%p2152_p3) target bundleno = 2010 (0x7da), region = 84 }
  0x2f   : > { %s521_s16 = scalar_lea.hbm %s2484_s1, %s1608_s18  ;;  %s540_s18 = scalar_lea.vmem (!%p2152_p3), [#allocation4], %s1610_s25 }
  0x30   : > { %s523_s21 = sshll.u32 %s521_s16, 4  ;;  %s524_s21 = int_to_ptr.hbm [resolvable:$true] %s523_s21 }
  0x31   : > { %1714 = dma.hbm_to_vmem [thread:$0]  (!%p1712_p11), %s524_s21, 64, %s526_s11, %s514_s14  }
  0x32   : > { %1976 = dma.done.wait (%p2180_p13), %s537_s10, 64  }
  0x33   : > { %1978 = vsyncadd (%p2180_p13), %s537_s10, 4294967232 }
  0x34   : > { %1980 = dma.done.wait (%p2144_p1), [#allocation8], 512  }
  0x35   : > { %1982 = vsyncadd (%p2144_p1), [#allocation8], 4294966784  ;;  %p607_p3 = scmp.lt.s32.totalorder %s2001_s24, 1  ;;  %s2485_s17 = sld [smem:[#allocation17_spill]]  ;;  %v1681_v0 = vld [vmem:[%s2446_s4 + $0x8] sm:$0xff]  ;;  %v1680_v2 = vld [vmem:[%s2446_s4] sm:$0xff] }
  0x36   : > { %v1683_v1 = vld [vmem:[%s2444_s2 + $0x8] sm:$0xff]  ;;  %v1682_v3 = vld [vmem:[%s2444_s2] sm:$0xff]  ;;  %651 = vmatpush.bf16.msra.mxu0 %v1681_v0  ;;  %vm641_vm0 = vcmask 261120   ;;  %vm659_vm1 = vcmask 257024   ;;  %s2016_s21 = smov 120   ;;  %vm919_vm2 = vcmask 1043456  }
  0x37   : > { %s608_s11 = scalar_select %p607_p3, %s2001_s24, 1  ;;  %697 = vmatpush.bf16.msra.mxu1 %v1683_v1  ;;  %v620_v6 = vld [vmem:[%s540_s18] sm:$0xf]  ;;  %v1794_v7 = vld [vmem:[%s2447_s5] ss:$0 sm:$0xff]  ;;  %vm715_vm3 = vcmask 1047556  }
  0x38   : > { %v1795_v8 = vld [vmem:[%s2445_s3] ss:$0 sm:$0xff]  ;;  %s2015_s18 = smov 104   ;;  %v2019_v25 = vmov 1983009808   ;;  %vm915_vm4 = vcmask 64512  }
  0x39   : > { %s1614_s13 = sshll.u32 %s608_s11, 3  ;;  %v720_v26 = vunpack.c.l.s4 %v2019_v25  ;;  %v2020_v39 = vmov 1934713408   ;;  %s2021_s30 = smov 16   ;;  %vm1264_vm5 = vcmask 130048   ;;  %vm1266_vm6 = vcmask 195584  }
  0x3a   : > { %652 = vmatpush.bf16.msra.mxu0 %v1680_v2  ;;  %v744_v40 = vunpack.c.l.s4 %v2020_v39  ;;  %s2022_s0 = smov 8   ;;  %s2023_s6 = smov 24   ;;  %vm1420_vm11 = vcmask 523264  }
  0x3b   : > { %s613_s25 = scalar_lea.vmem %s2485_s17, %s1614_s13  ;;  %698 = vmatpush.bf16.msra.mxu1 %v1682_v3  ;;  %s2017_s17 = smov 112   ;;  %v2257_v31 = vunpack.c.0.s8 %v720_v26 }
  0x3c   : > { %v2233_v4 = vld [vmem:[%s613_s25] sm:$0xff]  ;;  %s2018_s25 = smov 96   ;;  %v2266_v45 = vunpack.c.0.s8 %v744_v40  ;;  %s2486_s14 = sld [smem:[#allocation21_spill]] }
  0x3d   : > { %v666_v5 = vpack.c.bf16 %v2233_v4, %v2233_v4  ;;  %1623 = vmatmul.msk.bf16.vlgmr.msra.gmra.mxu0 %vm641_vm0, %v620_v6  ;;  %s2487_s11 = sld [smem:[#allocation22_spill]]  ;;  %s1613_s13 = sshll.u32 %s2204_s20, 3 }
  0x3e   : > { %s1677_s1 = sshll.u32 %s2001_s24, 3  ;;  %s606_s24 = scalar_lea.vmem [#allocation10], %s1613_s13 }
  0x3f   : > { %1632 = vmatmul.msk.bf16.vlgmr.msra.gmra.mxu1 %vm641_vm0, %v666_v5  ;;  %s1485_s28 = sshll.u32 %s606_s24, 4  ;;  %s1486_s28 = int_to_ptr.vmem [resolvable:$true] %s1485_s28 }
  0xba   : > { %v654_v9 = vpop.f32.mrf.mxu0 }
  0xbb   : > { %v655_v11 = vadd.f32 %v1794_v7, %v654_v9 }
  0xbc   : > { %v700_v10 = vpop.f32.mrf.mxu1 }
  0xbd   : > { %v701_v12 = vadd.f32 %v1795_v8, %v700_v10  ;;  %v658_v13 = vpack.c.bf16 %v655_v11, %v655_v11 }
  0xbf   : > { %711 = vrot.lane.b32.xlu1 %v701_v12, %s2015_s18  ;;  %705 = vrot.lane.b32.xlu0 %v701_v12, %s2016_s21  ;;  %660 = vst.msk [vmem:[#allocation2] sm:$0xf] %vm659_vm1, %v658_v13  ;;  %v717_v28 = vrot.slane %v701_v12, 4 }
  0xc2   : > { %v656_v14 = vpop.f32.mrf.mxu0 }
  0xc4   : > { %v702_v15 = vpop.f32.mrf.mxu1 }
  0xc6   : > { %v779_v16 = vld [vmem:[#allocation2] sm:$0xf] }
  0xc7   : > { %708 = vrot.lane.b32.xlu0 %v701_v12, %s2017_s17  ;;  %784 = vrot.lane.b32.xlu2 %v779_v16, %s2017_s17 }
  0xc8   : > { %781 = vrot.lane.b32.xlu1 %v779_v16, %s2016_s21 }
  0xcf   : > { %787 = vrot.lane.b32.xlu2 %v779_v16, %s2015_s18 }
  0xd7   : > { %662 = vrot.lane.b32.xlu2 %v658_v13, %s2018_s25 }
 0x121   : > { %v785_v17 = vpop.permute.xlu2 %784 }
 0x129   : > { %v788_v18 = vpop.permute.xlu2 %787 }
 0x12a   : > { %1791 = vxpose.binary.xlu1.c.b16.start.end [1/2] (short) (narrow) %v788_v18, %v785_v17, 16 }
 0x131   : > { %v712_v19 = vpop.permute.xlu1 %711  ;;  %v663_v20 = vpop.permute.xlu2 %662 }
 0x132   : > { %665 = vst.msk [vmem:[#allocation3] sm:$0xf] %vm659_vm1, %v663_v20  ;;  %v706_v24 = vpop.permute.xlu0 %705  ;;  %v727_v35 = vrot.slane %v712_v19, 4 }
 0x133   : > { %v729_v32 = vrot.slane %v706_v24, 4 }
 0x134   : > { %v728_v42 = vsel %vm715_vm3, %v727_v35, %v706_v24 }
 0x135   : > { %v730_v36 = vsel %vm715_vm3, %v712_v19, %v729_v32  ;;  %v734_v46 = vperm.slane %v728_v42, %v2257_v31 }
 0x136   : > { %v738_v41 = vperm.slane %v730_v36, %v2257_v31 }
 0x137   : > { %v739_v53 = vrot.slane %v734_v46, 4 }
 0x138   : > { %v751_v48 = vrot.slane %v738_v41, 4 }
 0x139   : > { %v2251_v22 = vld [vmem:[#allocation3] sm:$0xf] }
 0x13a   : > { %v782_v21 = vpop.permute.xlu1 %781  ;;  %v1057_v23 = vsel %vm919_vm2, %v2251_v22, 0  ;;  %v709_v27 = vpop.permute.xlu0 %708 }
 0x13b   : > { %1788 = vxpose.binary.xlu0.c.b16.start.end [1/2] (short) (narrow) %v782_v21, %v779_v16, 16  ;;  %v714_v29 = vrot.slane %v709_v27, 4  ;;  %v718_v30 = vsel %vm715_vm3, %v709_v27, %v717_v28 }
 0x13c   : > { %1066 = vmatpush.bf16.msrb.mxu0 %v1057_v23  ;;  %v726_v33 = vperm.slane %v718_v30, %v2257_v31 }
 0x13d   : > { %v716_v34 = vsel %vm715_vm3, %v714_v29, %v701_v12 }
 0x13e   : > { %v722_v37 = vperm.slane %v716_v34, %v2257_v31  ;;  %v753_v38 = vrot.slane %v726_v33, 4  ;;  %v752_v50 = vsel %vm715_vm3, %v751_v48, %v726_v33 }
 0x13f   : > { %v758_v54 = vperm.slane %v752_v50, %v2266_v45 }
 0x140   : > { %v741_v43 = vrot.slane %v722_v37, 4  ;;  %v754_v44 = vsel %vm715_vm3, %v738_v41, %v753_v38  ;;  %v740_v55 = vsel %vm715_vm3, %v739_v53, %v722_v37 }
 0x141   : > { %v762_v47 = vperm.slane %v754_v44, %v2266_v45  ;;  %v746_v58 = vperm.slane %v740_v55, %v2266_v45  ;;  %v767_v59 = vrot.slane %v758_v54, 4  ;;  %v775_v8 = vpack.c.bf16 %v758_v54, %v758_v54 }
 0x142   : > { %v742_v49 = vsel %vm715_vm3, %v734_v46, %v741_v43 }
 0x143   : > { %v750_v51 = vperm.slane %v742_v49, %v2266_v45  ;;  %v769_v52 = vrot.slane %v762_v47, 4  ;;  %v777_v62 = vpack.c.bf16 %v762_v47, %v762_v47  ;;  %v763_v63 = vrot.slane %v746_v58, 4 }
 0x144   : > { %v768_v0 = vsel %vm715_vm3, 0.0, %v767_v59  ;;  %v771_v14 = vpack.c.bf16 %v746_v58, %v746_v58  ;;  %v798_v15 = vrot.slane %v775_v8, 4 }
 0x145   : > { %v765_v56 = vrot.slane %v750_v51, 4  ;;  %v770_v57 = vsel %vm715_vm3, 0.0, %v769_v52  ;;  %v773_v3 = vpack.c.bf16 %v750_v51, %v750_v51  ;;  %v776_v5 = vpack.c.bf16 %v768_v0, %v768_v0 }
 0x146   : > { %v778_v60 = vpack.c.bf16 %v770_v57, %v770_v57  ;;  %v805_v6 = vrot.slane %v777_v62, 4  ;;  %v764_v7 = vsel %vm715_vm3, 0.0, %v763_v63  ;;  %v800_v19 = vsel %vm715_vm3, %v798_v15, %v771_v14 }
 0x147   : > { %v766_v61 = vsel %vm715_vm3, 0.0, %v765_v56  ;;  %v772_v10 = vpack.c.bf16 %v764_v7, %v764_v7  ;;  %v819_v11 = vrot.slane %v776_v5, 4  ;;  %v804_v24 = vperm.slane %v800_v19, %v2257_v31 }
 0x148   : > { %v774_v1 = vpack.c.bf16 %v766_v61, %v766_v61  ;;  %v825_v2 = vrot.slane %v778_v60, 4  ;;  %v806_v12 = vsel %vm715_vm3, %v805_v6, %v773_v3 }
 0x149   : > { %v810_v16 = vperm.slane %v806_v12, %v2257_v31  ;;  %v820_v17 = vsel %vm715_vm3, %v819_v11, %v772_v10 }
 0x14a   : > { %v826_v9 = vsel %vm715_vm3, %v825_v2, %v774_v1  ;;  %v824_v21 = vperm.slane %v820_v17, %v2257_v31 }
 0x14b   : > { %v830_v13 = vperm.slane %v826_v9, %v2257_v31  ;;  %v811_v20 = vrot.slane %v810_v16, 4 }
 0x14d   : > { %v831_v18 = vrot.slane %v830_v13, 4  ;;  %v812_v26 = vsel %vm715_vm3, %v811_v20, %v804_v24 }
 0x14e   : > { %v816_v32 = vperm.slane %v812_v26, %v2266_v45 }
 0x14f   : > { %v832_v25 = vsel %vm715_vm3, %v831_v18, %v824_v21 }
 0x150   : > { %v836_v27 = vperm.slane %v832_v25, %v2266_v45  ;;  %v842_v39 = vshrl.u32 %v816_v32, 16  ;;  %v817_v42 = vrot.slane %v816_v32, 4 }
 0x152   : > { %v841_v33 = vpack.i.b16 %v836_v27, %v816_v32  ;;  %v843_v35 = vshrl.u32 %v836_v27, 16  ;;  %v837_v41 = vrot.slane %v836_v27, 4  ;;  %v818_v47 = vsel %vm715_vm3, 0, %v817_v42 }
 0x153   : > { %v848_v50 = vshrl.u32 %v818_v47, 16 }
 0x154   : > { %v844_v40 = vpack.i.b16 %v843_v35, %v842_v39  ;;  %v838_v44 = vsel %vm715_vm3, 0, %v837_v41 }
 0x155   : > { %v847_v48 = vpack.i.b16 %v838_v44, %v818_v47  ;;  %v849_v49 = vshrl.u32 %v838_v44, 16 }
 0x157   : > { %v850_v51 = vpack.i.b16 %v849_v49, %v848_v50 }
 0x184   : > { %794 = vrot.lane.b32.xlu1 %v2251_v22, %s2017_s17 }
 0x1d6   : > { %v1792_v23 = vpop.trf.xlu1 }
 0x1d7   : > { %v959_v29 = vsel %vm919_vm2, %v1792_v23, 0 }
 0x1de   : > { %v1793_v34 = vpop.trf.xlu1 }
 0x1df   : > { %v978_v37 = vsel %vm919_vm2, %v1793_v34, 0 }
 0x1e7   : > { %v1789_v28 = vpop.trf.xlu0 }
 0x1e8   : > { %v921_v30 = vsel %vm919_vm2, %v1789_v28, 0 }
 0x1e9   : > { %930 = vmatpush.bf16.msra.mxu2 %v921_v30 }
 0x1ec   : > { %1633 = vmatmul.msk.bf16.vlgmr.msra.gmra.mxu2 %vm915_vm4, %v841_v33 }
 0x1ed   : > { %968 = vmatpush.bf16.msrb.mxu2 %v959_v29 }
 0x1ef   : > { %v1790_v36 = vpop.trf.xlu0 }
 0x1f0   : > { %v940_v38 = vsel %vm919_vm2, %v1790_v36, 0 }
 0x1f1   : > { %949 = vmatpush.bf16.msra.mxu3 %v940_v38 }
 0x1f4   : > { %1634 = vmatmul.msk.bf16.vlgmr.msra.gmra.mxu3 %vm915_vm4, %v844_v40 }
 0x1f5   : > { %987 = vmatpush.bf16.msrb.mxu3 %v978_v37 }
 0x1f6   : > { %v795_v43 = vpop.permute.xlu1 %794 }
 0x1f7   : > { %v1095_v46 = vsel %vm919_vm2, %v795_v43, 0 }
 0x1f8   : > { %1104 = vmatpush.bf16.msra.mxu2 %v1095_v46 }
 0x1fc   : > { %1635 = vmatmul.msk.bf16.vlgmr.msrb.gmra.mxu2 %vm915_vm4, %v847_v48 }
 0x204   : > { %1636 = vmatmul.msk.bf16.vlgmr.msrb.gmra.mxu3 %vm915_vm4, %v850_v51 }
 0x26f   : > { %v932_v52 = vpop.f32.mrf.mxu2 }
 0x270   : > { %v993_v61 = vsel %vm915_vm4, %v932_v52, -inf }
 0x277   : > { %v934_v53 = vpop.f32.mrf.mxu2  ;;  %v951_v54 = vpop.f32.mrf.mxu3 }
 0x278   : > { %v996_v63 = vsel %vm915_vm4, %v951_v54, -inf }
 0x27f   : > { %v953_v55 = vpop.f32.mrf.mxu3  ;;  %v970_v56 = vpop.f32.mrf.mxu2 }
 0x280   : > { %v999_v57 = vsel %vm915_vm4, %v970_v56, -inf }
 0x281   : > { %1000 = vmax.xlane.f32.xlu2 %v999_v57 }
 0x287   : > { %v972_v58 = vpop.f32.mrf.mxu2  ;;  %v989_v59 = vpop.f32.mrf.mxu3 }
 0x288   : > { %v1002_v60 = vsel %vm915_vm4, %v989_v59, -inf }
 0x289   : > { %1003 = vmax.xlane.f32.xlu0 %v1002_v60  ;;  %994 = vmax.xlane.f32.xlu2 %v993_v61 }
 0x28f   : > { %v991_v62 = vpop.f32.mrf.mxu3 }
 0x291   : > { %997 = vmax.xlane.f32.xlu2 %v996_v63 }
 0x2a9   : > { %796 = vrot.lane.b32.xlu2 %v2251_v22, %s2015_s18 }
 0x2b1   : > { %792 = vrot.lane.b32.xlu2 %v2251_v22, %s2016_s21  ;;  %s2488_s21 = sld [smem:[#allocation23_spill]] }
 0x2f4   : > { %v1001_v0 = vpop.xlane.xlu2 %1000 }
 0x2f5   : > { %v1019_v1 = vsub.f32 %v970_v56, %v1001_v0  ;;  %v1007_v32 = vsub.f32 -inf, %v1001_v0 }
 0x2f7   : > { %v1025_v2 = vmul.f32 1.442695, %v1019_v1  ;;  %v1013_v33 = vmul.f32 1.442695, %v1007_v32 }
 0x2f9   : > { %1803 = vpow2.f32 %v1025_v2 }
 0x2fc   : > { %v1004_v3 = vpop.xlane.xlu0 %1003  ;;  %v995_v5 = vpop.xlane.xlu2 %994 }
 0x2fd   : > { %v1020_v6 = vsub.f32 %v989_v59, %v1004_v3  ;;  %v1017_v7 = vsub.f32 %v932_v52, %v995_v5  ;;  %v1005_v29 = vsub.f32 -inf, %v995_v5  ;;  %v1008_v34 = vsub.f32 -inf, %v1004_v3 }
 0x2ff   : > { %v1027_v8 = vmul.f32 1.442695, %v1020_v6  ;;  %v1804_v9 = vpop.eup %1803  ;;  %v1021_v10 = vmul.f32 1.442695, %v1017_v7  ;;  %v1009_v30 = vmul.f32 1.442695, %v1005_v29 }
 0x300   : > { %v1051_v11 = vpack.c.bf16 %v1804_v9, %v1804_v9  ;;  %v1039_v23 = vsel %vm915_vm4, %v1804_v9, 0.0  ;;  %v1015_v36 = vmul.f32 1.442695, %v1008_v34 }
 0x301   : > { %1805 = vpow2.f32 %v1027_v8 }
 0x302   : > { %1639 = vmatmul.msk.bf16.vlgmr.msra.gmra.mxu2 %vm915_vm4, %v1051_v11  ;;  %1807 = vpow2.f32 %v1021_v10 }
 0x304   : > { %v998_v12 = vpop.xlane.xlu2 %997 }
 0x305   : > { %v1018_v13 = vsub.f32 %v951_v54, %v998_v12  ;;  %v1006_v37 = vsub.f32 -inf, %v998_v12 }
 0x307   : > { %v1806_v14 = vpop.eup %1805  ;;  %v1023_v16 = vmul.f32 1.442695, %v1018_v13  ;;  %v1011_v40 = vmul.f32 1.442695, %v1006_v37 }
 0x308   : > { %v1042_v22 = vsel %vm915_vm4, %v1806_v14, 0.0  ;;  %v1808_v15 = vpop.eup %1807  ;;  %v1052_v21 = vpack.c.bf16 %v1806_v14, %v1806_v14 }
 0x309   : > { %1043 = vadd.xlane.f32.xlu1 %v1042_v22  ;;  %v1033_v17 = vsel %vm915_vm4, %v1808_v15, 0.0  ;;  %v1049_v18 = vpack.c.bf16 %v1808_v15, %v1808_v15  ;;  %1809 = vpow2.f32 %v1023_v16 }
 0x30a   : > { %1034 = vadd.xlane.f32.xlu2 %v1033_v17  ;;  %1811 = vpow2.f32 %v1009_v30 }
 0x30b   : > { %1637 = vmatmul.msk.bf16.vlgmr.msrb.gmra.mxu0 %vm915_vm4, %v1049_v18  ;;  %1813 = vpow2.f32 %v1013_v33 }
 0x30c   : > { %v797_v19 = vpop.permute.xlu2 %796  ;;  %1815 = vpow2.f32 %v1015_v36 }
 0x30d   : > { %v1114_v20 = vsel %vm919_vm2, %v797_v19, 0  ;;  %1817 = vpow2.f32 %v1011_v40 }
 0x30e   : > { %1123 = vmatpush.bf16.msra.mxu3 %v1114_v20 }
 0x30f   : > { %v1810_v24 = vpop.eup %1809 }
 0x310   : > { %v1050_v27 = vpack.c.bf16 %v1810_v24, %v1810_v24  ;;  %v1036_v28 = vsel %vm915_vm4, %v1810_v24, 0.0  ;;  %v1812_v35 = vpop.eup %1811 }
 0x311   : > { %1640 = vmatmul.msk.bf16.vlgmr.msra.gmra.mxu3 %vm915_vm4, %v1052_v21  ;;  %v1029_v39 = vmul.f32 0.0, %v1812_v35  ;;  %v1814_v42 = vpop.eup %1813 }
 0x312   : > { %1040 = vadd.xlane.f32.xlu2 %v1039_v23  ;;  %v1031_v43 = vmul.f32 0.0, %v1814_v42  ;;  %v1816_v46 = vpop.eup %1815 }
 0x313   : > { %v1032_v50 = vmul.f32 0.0, %v1816_v46  ;;  %v1818_v52 = vpop.eup %1817 }
 0x314   : > { %v793_v25 = vpop.permute.xlu2 %792  ;;  %v1030_v57 = vmul.f32 0.0, %v1818_v52 }
 0x315   : > { %v1076_v26 = vsel %vm919_vm2, %v793_v25, 0 }
 0x316   : > { %1085 = vmatpush.bf16.msrb.mxu1 %v1076_v26 }
 0x319   : > { %1638 = vmatmul.msk.bf16.vlgmr.msrb.gmra.mxu1 %vm915_vm4, %v1050_v27 }
 0x31a   : > { %1037 = vadd.xlane.f32.xlu2 %v1036_v28 }
 0x37c   : > { %v1044_v49 = vpop.xlane.xlu1 %1043 }
 0x37d   : > { %v1035_v38 = vpop.xlane.xlu2 %1034  ;;  %v1048_v55 = vadd.f32 %v1044_v49, %v1032_v50 }
 0x37e   : > { %v1045_v41 = vadd.f32 %v1035_v38, %v1029_v39 }
 0x380   : > { %1819 = vrcp.f32 %v1045_v41 }
 0x385   : > { %v1106_v44 = vpop.f32.mrf.mxu2  ;;  %v1041_v47 = vpop.xlane.xlu2 %1040 }
 0x386   : > { %v1047_v48 = vadd.f32 %v1041_v47, %v1031_v43  ;;  %v1820_v54 = vpop.eup %1819  ;;  %v1131_v59 = vadd.f32 %v1106_v44, %v1031_v43 }
 0x388   : > { %1821 = vrcp.f32 %v1047_v48  ;;  %v1068_v51 = vpop.f32.mrf.mxu0 }
 0x389   : > { %v1129_v53 = vadd.f32 %v1068_v51, %v1029_v39  ;;  %1823 = vrcp.f32 %v1048_v55 }
 0x38b   : > { %v1137_v56 = vmul.f32 %v1820_v54, %v1129_v53 }
 0x38d   : > { %v1108_v58 = vpop.f32.mrf.mxu2  ;;  %v1038_v60 = vpop.xlane.xlu2 %1037  ;;  %v1143_v0 = vrot.slane %v1137_v56, 4 }
 0x38e   : > { %v1822_v61 = vpop.eup %1821  ;;  %v1046_v62 = vadd.f32 %v1038_v60, %v1030_v57 }
 0x38f   : > { %v1139_v63 = vmul.f32 %v1822_v61, %v1131_v59  ;;  %v1824_v8 = vpop.eup %1823 }
 0x390   : > { %1825 = vrcp.f32 %v1046_v62  ;;  %v1070_v1 = vpop.f32.mrf.mxu0 }
 0x391   : > { %v1141_v2 = vrot.slane %v1139_v63, 4  ;;  %v1144_v3 = vsel %vm715_vm3, %v1139_v63, %v1143_v0 }
 0x392   : > { %v1152_v15 = vperm.slane %v1144_v3, %v2257_v31 }
 0x393   : > { %v1142_v6 = vsel %vm715_vm3, %v1141_v2, %v1137_v56 }
 0x394   : > { %v1125_v5 = vpop.f32.mrf.mxu3  ;;  %v1148_v13 = vperm.slane %v1142_v6, %v2257_v31  ;;  %v1179_v23 = vrot.slane %v1152_v15, 4 }
 0x395   : > { %v1132_v7 = vadd.f32 %v1125_v5, %v1032_v50 }
 0x396   : > { %v1087_v9 = vpop.f32.mrf.mxu1  ;;  %v1826_v12 = vpop.eup %1825  ;;  %v1167_v18 = vrot.slane %v1148_v13, 4 }
 0x397   : > { %v1140_v10 = vmul.f32 %v1824_v8, %v1132_v7  ;;  %v1130_v11 = vadd.f32 %v1087_v9, %v1030_v57 }
 0x399   : > { %v1153_v14 = vrot.slane %v1140_v10, 4  ;;  %v1138_v22 = vmul.f32 %v1826_v12, %v1130_v11  ;;  %v1685_v12 = vld [vmem:[#allocation7 + $0x8] sm:$0xff] }
 0x39a   : > { %1298 = vmatpush.bf16.msra.mxu0 %v1685_v12 }
 0x39b   : > { %v1154_v16 = vsel %vm715_vm3, %v1153_v14, %v1138_v22  ;;  %v1155_v17 = vrot.slane %v1138_v22, 4 }
 0x39c   : > { %v1160_v19 = vperm.slane %v1154_v16, %v2257_v31  ;;  %v1127_v20 = vpop.f32.mrf.mxu3 }
 0x39d   : > { %v1156_v21 = vsel %vm715_vm3, %v1140_v10, %v1155_v17 }
 0x39e   : > { %v1164_v24 = vperm.slane %v1156_v21, %v2257_v31  ;;  %v1165_v25 = vrot.slane %v1160_v19, 4  ;;  %v1168_v26 = vsel %vm715_vm3, %v1160_v19, %v1167_v18  ;;  %v1089_v27 = vpop.f32.mrf.mxu1  ;;  %v1796_v19 = vld [vmem:[%s2449_s7] ss:$0 sm:$0xff] }
 0x39f   : > { %v1176_v28 = vperm.slane %v1168_v26, %v2266_v45  ;;  %v2024_v26 = vmov 32.0  }
 0x3a0   : > { %v1166_v29 = vsel %vm715_vm3, %v1165_v25, %v1148_v13  ;;  %v1177_v30 = vrot.slane %v1164_v24, 4  ;;  %v1180_v32 = vsel %vm715_vm3, %v1164_v24, %v1179_v23  ;;  %v1684_v13 = vld [vmem:[#allocation7] sm:$0xff]  ;;  %1827 = vrcp.f32 %v2024_v26 }
 0x3a1   : > { %v1172_v33 = vperm.slane %v1166_v29, %v2266_v45  ;;  %v1188_v34 = vperm.slane %v1180_v32, %v2266_v45  ;;  %v1191_v35 = vrot.slane %v1176_v28, 4  ;;  %1299 = vmatpush.bf16.msra.mxu0 %v1684_v13 }
 0x3a2   : > { %v1178_v36 = vsel %vm715_vm3, %v1177_v30, %v1152_v15 }
 0x3a3   : > { %v1184_v37 = vperm.slane %v1178_v36, %v2266_v45  ;;  %v1192_v38 = vsel %vm715_vm3, 0.0, %v1191_v35  ;;  %v1195_v39 = vrot.slane %v1188_v34, 4  ;;  %v1189_v40 = vrot.slane %v1172_v33, 4 }
 0x3a4   : > { %v1202_v41 = vrot.slane %v1192_v38, 4  ;;  %v1197_v42 = vsel %vm715_vm3, %v1191_v35, %v1172_v33 }
 0x3a5   : > { %v1196_v43 = vsel %vm715_vm3, 0.0, %v1195_v39  ;;  %v1190_v44 = vsel %vm715_vm3, 0.0, %v1189_v40  ;;  %v1193_v46 = vrot.slane %v1184_v37, 4  ;;  %v1201_v47 = vperm.slane %v1197_v42, %v2257_v31  ;;  %v1691_v40 = vld [vmem:[%s2454_s12 + $0x18] sm:$0xff] }
 0x3a6   : > { %v1213_v48 = vrot.slane %v1196_v43, 4  ;;  %v1203_v49 = vsel %vm715_vm3, %v1202_v41, %v1190_v44  ;;  %v1208_v50 = vsel %vm715_vm3, %v1195_v39, %v1184_v37  ;;  %v1828_v27 = vpop.eup %1827  ;;  %v1686_v39 = vld [vmem:[#allocation9] sm:$0xff]  ;;  %1428 = vmatpush.bf16.msrb.mxu2 %v1691_v40  ;;  %v1690_v43 = vld [vmem:[%s2454_s12 + $0x10] sm:$0xff] }
 0x3a7   : > { %v1194_v51 = vsel %vm715_vm3, 0.0, %v1193_v46  ;;  %v1207_v52 = vperm.slane %v1203_v49, %v2257_v31  ;;  %v1212_v53 = vperm.slane %v1208_v50, %v2257_v31  ;;  %v1221_v54 = vrot.slane %v1201_v47, 4 }
 0x3a8   : > { %v1214_v55 = vsel %vm715_vm3, %v1213_v48, %v1194_v51  ;;  %v1312_v28 = vmul.f32 32.0, %v1828_v27  ;;  %vm1316_vm7 = vweird.f32 %v1828_v27 }
 0x3a9   : > { %v1218_v56 = vperm.slane %v1214_v55, %v2257_v31  ;;  %v1222_v57 = vsel %vm715_vm3, %v1207_v52, %v1221_v54  ;;  %v1233_v58 = vrot.slane %v1212_v53, 4  ;;  %v1219_v59 = vrot.slane %v1207_v52, 4  ;;  %v1797_v52 = vld [vmem:[%s2450_s8] ss:$0 sm:$0xff] }
 0x3aa   : > { %v1230_v60 = vperm.slane %v1222_v57, %v2266_v45  ;;  %v1313_v29 = vsub.f32 1.0, %v1312_v28  ;;  %1429 = vmatpush.bf16.msrb.mxu2 %v1690_v43  ;;  %v1798_v54 = vld [vmem:[%s2451_s9] ss:$0 sm:$0xff] }
 0x3ab   : > { %v1234_v61 = vsel %vm715_vm3, %v1218_v56, %v1233_v58  ;;  %v1220_v62 = vsel %vm715_vm3, %v1219_v59, %v1201_v47  ;;  %v1231_v63 = vrot.slane %v1218_v56, 4  ;;  %v1689_v59 = vld [vmem:[%s2454_s12 + $0x8] sm:$0xff] }
 0x3ac   : > { %v1242_v0 = vperm.slane %v1234_v61, %v2266_v45  ;;  %v1226_v1 = vperm.slane %v1220_v62, %v2266_v45  ;;  %v1249_v2 = vrot.slane %v1230_v60, 4  ;;  %v1314_v30 = vmul.f32 %v1828_v27, %v1313_v29  ;;  %v1799_v61 = vld [vmem:[%s2486_s14] ss:$0 sm:$0xff]  ;;  %s2490_s14 = sld [smem:[#allocation24_spill]] }
 0x3ad   : > { %v1232_v3 = vsel %vm715_vm3, %v1231_v63, %v1212_v53 }
 0x3ae   : > { %v1247_v5 = vrot.slane %v1242_v0, 4  ;;  %v1238_v31 = vperm.slane %v1232_v3, %v2266_v45  ;;  %v1245_v6 = vrot.slane %v1226_v1, 4  ;;  %v1250_v7 = vsel %vm715_vm3, %v1242_v0, %v1249_v2  ;;  %1430 = vmatpush.bf16.msrb.mxu2 %v1689_v59  ;;  %v1800_v3 = vld [vmem:[%s2487_s11] ss:$0 sm:$0xff]  ;;  %s1472_s11 = scalar_lea.sflag [#allocation6], %s2204_s20 }
 0x3af   : > { %v1315_v32 = vadd.f32 %v1828_v27, %v1314_v30 }
 0x3b0   : > { %v1248_v8 = vsel %vm715_vm3, %v1247_v5, %v1230_v60  ;;  %v1243_v9 = vrot.slane %v1238_v31, 4  ;;  %v1246_v10 = vsel %vm715_vm3, %v1238_v31, %v1245_v6  ;;  %v1688_v60 = vld [vmem:[%s2454_s12] sm:$0xff] }
 0x3b1   : > { %1256 = vrot.lane.b32.xlu2 %v1248_v8, %s2021_s30  ;;  %1252 = vrot.lane.b32.xlu0 %v1246_v10, %s2022_s0  ;;  %v1317_v33 = vsel %vm1316_vm7, %v1828_v27, %v1315_v32  ;;  %s2489_s30 = sld [smem:[#allocation25_spill]] }
 0x3b2   : > { %v1244_v11 = vsel %vm715_vm3, %v1243_v9, %v1226_v1  ;;  %1431 = vmatpush.bf16.msrb.mxu2 %v1688_v60 }
 0x3b7   : > { %s1483_s0 = scalar_lea.hbm %s2489_s30, %s1677_s1  ;;  %s1943_s13 = scalar_lea.hbm %s2489_s30, 16 }
 0x3b8   : > { %s1487_s10 = sshll.u32 %s1483_s0, 4  ;;  %s1488_s10 = int_to_ptr.hbm [resolvable:$true] %s1487_s10 }
 0x3b9   : > { %1260 = vrot.lane.b32.xlu0 %v1250_v7, %s2023_s6  ;;  %s1937_s16 = sshra.s32 %s1488_s10, 4  ;;  %s1938_s16 = int_to_ptr.hbm [resolvable:$true] %s1937_s16 }
 0x3ba   : > { %s1939_s1 = scalar_lea.hbm %s1938_s16, 8  ;;  %p1944_p10 = scmp.lt.s32.totalorder %s1938_s16, %s2489_s30 }
 0x3bb   : > { %p1940_p1 = scmp.ne.s32.totalorder %s1938_s16, %s1939_s1  ;;  %p1945_p12 = scmp.lt.s32.totalorder %s1943_s13, %s1939_s1 }
 0x3bd   : > { %p1941_p8 = pnand %p1940_p1, %p2184_p0  ;;  %p1946_p13 = por %p1945_p12, %p1944_p10 }
 0x3bf   : > { %p1942_p9 = pneg %p1941_p8 }
 0x3c1   : > { %p1947_p2 = pnand %p1946_p13, %p1942_p9 }
 0x40b   : > { %v1257_v22 = vpop.permute.xlu2 %1256 }
 0x423   : > { %v1253_v45 = vpop.permute.xlu0 %1252 }
 0x424   : > { %v1263_v14 = vsel %vm915_vm4, %v1244_v11, %v1253_v45 }
 0x425   : > { %v1265_v16 = vsel %vm1264_vm5, %v1263_v14, %v1257_v22 }
 0x42b   : > { %v1261_v15 = vpop.permute.xlu0 %1260 }
 0x42c   : > { %v1267_v17 = vsel %vm1266_vm6, %v1265_v16, %v1261_v15 }
 0x42d   : > { %v1268_v18 = vpack.c.bf16 %v1267_v17, %v1267_v17 }
 0x42f   : > { %1649 = vmatmul.msk.bf16.vlgmr.msra.gmra.mxu0 %vm641_vm0, %v1268_v18 }
 0x4ac   : > { %v1301_v20 = vpop.f32.mrf.mxu0 }
 0x4ad   : > { %v1302_v21 = vadd.f32 %v1796_v19, %v1301_v20 }
 0x4af   : > { %v1305_v23 = vadd.f32 %v1302_v21, %v2233_v4  ;;  %v1687_v4 = vld [vmem:[#allocation9 + $0x8] sm:$0xff]  ;;  %v1801_v21 = vld [vmem:[%s2488_s21] ss:$0 sm:$0xff] }
 0x4b0   : > { %1375 = vmatpush.bf16.msra.mxu1 %v1687_v4 }
 0x4b1   : > { %v1308_v24 = vsel %vm641_vm0, %v1305_v23, 0.0 }
 0x4b2   : > { %1309 = vadd.xlane.f32.xlu0 %v1308_v24 }
 0x4b4   : > { %v1303_v25 = vpop.f32.mrf.mxu0  ;;  %1376 = vmatpush.bf16.msra.mxu1 %v1686_v39 }
 0x4b5   : > { %v1802_v25 = vld [vmem:[%s2490_s14] ss:$0 sm:$0xff] }
 0x525   : > { %v1310_v34 = vpop.xlane.xlu0 %1309 }
 0x526   : > { %v1318_v35 = vmul.f32 %v1317_v33, %v1310_v34 }
 0x528   : > { %v1319_v36 = vsub.f32 %v1305_v23, %v1318_v35 }
 0x52a   : > { %v1320_v37 = vmul.f32 %v1319_v36, %v1319_v36 }
 0x52c   : > { %v1321_v38 = vsel %vm641_vm0, %v1320_v37, 0.0 }
 0x52d   : > { %1322 = vadd.xlane.f32.xlu2 %v1321_v38 }
 0x5a0   : > { %v1323_v41 = vpop.xlane.xlu2 %1322 }
 0x5a1   : > { %v1324_v42 = vmul.f32 %v1323_v41, %v1317_v33 }
 0x5a3   : > { %v1325_v44 = vadd.f32 1e-05, %v1324_v42 }
 0x5a5   : > { %1829 = vrsqrt.f32 %v1325_v44  ;;  %vm1332_vm9 = vweird.f32 %v1325_v44 }
 0x5ab   : > { %v1830_v46 = vpop.eup %1829 }
 0x5ac   : > { %v1327_v47 = vmul.f32 %v1830_v46, %v1325_v44  ;;  %vm1333_vm8 = vweird.f32 %v1830_v46 }
 0x5ad   : > { %vm1334_vm10 = vmor %vm1332_vm9, %vm1333_vm8 }
 0x5ae   : > { %v1328_v48 = vmul.f32 %v1830_v46, %v1327_v47 }
 0x5b0   : > { %v1329_v49 = vmul.f32 0.5, %v1328_v48 }
 0x5b2   : > { %v1330_v50 = vsub.f32 1.5, %v1329_v49 }
 0x5b4   : > { %v1331_v51 = vmul.f32 %v1830_v46, %v1330_v50 }
 0x5b6   : > { %v1335_v53 = vsel %vm1334_vm10, %v1830_v46, %v1331_v51 }
 0x5b7   : > { %v1336_v55 = vmul.f32 %v1335_v53, %v1319_v36 }
 0x5b9   : > { %v1340_v56 = vmul.f32 %v1797_v52, %v1336_v55 }
 0x5bb   : > { %v1344_v57 = vadd.f32 %v1798_v54, %v1340_v56 }
 0x5bd   : > { %v1345_v58 = vpack.c.bf16 %v1344_v57, %v1344_v57 }
 0x5bf   : > { %1658 = vmatmul.msk.bf16.vlgmr.msra.gmra.mxu1 %vm641_vm0, %v1345_v58 }
 0x63c   : > { %v1378_v62 = vpop.f32.mrf.mxu1 }
 0x63d   : > { %v1379_v63 = vadd.f32 %v1799_v61, %v1378_v62 }
 0x63f   : > { %v1382_v0 = vmax.f32 %v1379_v63, 0.0 }
 0x641   : > { %v1383_v1 = vpack.c.bf16 %v1382_v0, %v1382_v0 }
 0x643   : > { %1675 = vmatmul.msk.bf16.vlgmr.msrb.gmra.mxu2 %vm1420_vm11, %v1383_v1 }
 0x644   : > { %v1380_v2 = vpop.f32.mrf.mxu1 }
 0x6c6   : > { %v1433_v5 = vpop.f32.mrf.mxu2 }
 0x6c7   : > { %v1434_v31 = vadd.f32 %v1800_v3, %v1433_v5 }
 0x6c9   : > { %v1437_v6 = vadd.f32 %v1434_v31, %v1344_v57 }
 0x6cb   : > { %v1440_v7 = vsel %vm641_vm0, %v1437_v6, 0.0 }
 0x6cc   : > { %1441 = vadd.xlane.f32.xlu1 %v1440_v7 }
 0x6ce   : > { %v1435_v8 = vpop.f32.mrf.mxu2 }
 0x73f   : > { %v1442_v9 = vpop.xlane.xlu1 %1441 }
 0x740   : > { %v1443_v10 = vmul.f32 %v1442_v9, %v1317_v33 }
 0x742   : > { %v1444_v11 = vsub.f32 %v1437_v6, %v1443_v10 }
 0x744   : > { %v1445_v12 = vmul.f32 %v1444_v11, %v1444_v11 }
 0x746   : > { %v1446_v13 = vsel %vm641_vm0, %v1445_v12, 0.0 }
 0x747   : > { %1447 = vadd.xlane.f32.xlu1 %v1446_v13 }
 0x7ba   : > { %v1448_v45 = vpop.xlane.xlu1 %1447 }
 0x7bb   : > { %v1449_v14 = vmul.f32 %v1448_v45, %v1317_v33 }
 0x7bd   : > { %v1450_v22 = vadd.f32 1e-05, %v1449_v14 }
 0x7bf   : > { %1831 = vrsqrt.f32 %v1450_v22  ;;  %vm1457_vm13 = vweird.f32 %v1450_v22 }
 0x7c5   : > { %v1832_v15 = vpop.eup %1831 }
 0x7c6   : > { %v1452_v16 = vmul.f32 %v1832_v15, %v1450_v22  ;;  %vm1458_vm12 = vweird.f32 %v1832_v15 }
 0x7c7   : > { %vm1459_vm14 = vmor %vm1457_vm13, %vm1458_vm12 }
 0x7c8   : > { %v1453_v17 = vmul.f32 %v1832_v15, %v1452_v16 }
 0x7ca   : > { %v1454_v18 = vmul.f32 0.5, %v1453_v17 }
 0x7cc   : > { %v1455_v19 = vsub.f32 1.5, %v1454_v18 }
 0x7ce   : > { %v1456_v20 = vmul.f32 %v1832_v15, %v1455_v19 }
 0x7d0   : > { %v1460_v23 = vsel %vm1459_vm14, %v1832_v15, %v1456_v20 }
 0x7d1   : > { %v1461_v24 = vmul.f32 %v1460_v23, %v1444_v11 }
 0x7d3   : > { %v1465_v26 = vmul.f32 %v1801_v21, %v1461_v24 }
 0x7d5   : > { %v1469_v27 = vadd.f32 %v1802_v25, %v1465_v26 }
 0x7d7   : > { %1470 = vst.msk [vmem:[%s606_s24] sm:$0xff] %vm641_vm0, %v1469_v27 }
 0x7d8   : > { %1950 = shalt.err (!%p1947_p2)
}
 0x7d9   : > { %1702 = dma.vmem_to_hbm [thread:$0]  (%p2184_p0), %s1486_s28, 128, %s1488_s10, %s1472_s11  }
 0x7da PF: > { %s2491_s20 = sld [smem:[#allocation14_spill]]  ;;  %p1716_p4 = pnand %p1606_p6, %p2191_p5 }
 0x7dc   : > { %p1717_p7 = pneg %p1716_p4 }
 0x7e0   : > { %s1499_s0 = sand.u32 1, %s2491_s20  }
 0x7e1   : > { %s1500_s6 = scalar_lea.sflag [#allocation6], %s1499_s0 }
 0x7e2   : > { %1984 = dma.done.wait (%p1717_p7), %s1500_s6, 128  }
 0x7e3   : > { %1986 = vsyncadd (%p1717_p7), %s1500_s6, 4294967168  ;;  %s33_s26 = sadd.s32 1, %s2009_s26   ;;  %s2492_s24 = sld [smem:[#allocation15_spill]] }
 0x7e4   : > { %p30_p11 = scmp.ge.s32.totalorder %s33_s26, 4   ;;  %s2493_s25 = sld [smem:[#allocation16_spill]] }
 0x7e5   : > { %s2494_s21 = smov %s1993_s22  ;;  %s2495_s22 = smov %s1997_s23 }
 0x7e6   : > { %s2496_s23 = smov %s2189_s27  ;;  %32 = sbr.rel (!%p30_p11) target bundleno = 17 (0x11), region = 144 }
 0x7eb   :  { %1506 = vsyncpa [#allocation5], 1 }
 0x7ec   :  { %1508 = vsyncpa [#allocation5 + $0x1], 1 }
 0x7ed   :  { %1509 = vsyncpa [#allocation8], 1 }
 0x7ee   :  { %1510 = vsyncpa [#allocation6], 1 }
 0x7ef   :  { %1512 = vsyncpa [#allocation6 + $0x1], 1 }

// kernel: tpu_custom_call.1
= control target key start
LH: loop header
LB: loop body
LE: loop exit
PB: predicated region body
PF: predicated region fallthrough
CT: control target
= control target key end

     0   :  { %s2442_s0 = inlined_call_operand.vmem [shape: f32[2,8,32], index: 0, kind: input, shape index: {}]   ;;  %s2443_s1 = inlined_call_operand.hbm [shape: bf16[2,8,32], index: 1, kind: input, shape index: {}]   ;;  %s2444_s2 = inlined_call_operand.vmem [shape: bf16[32,32], index: 2, kind: input, shape index: {}]   ;;  %s2445_s3 = inlined_call_operand.vmem [shape: f32[1,32], index: 3, kind: input, shape index: {}]   ;;  %s2446_s4 = inlined_call_operand.vmem [shape: bf16[32,64], index: 4, kind: input, shape index: {}]   ;;  %s2447_s5 = inlined_call_operand.vmem [shape: f32[1,64], index: 5, kind: input, shape index: {}]   ;;  %s2448_s6 = inlined_call_operand.hbm [shape: bf16[32,32], index: 6, kind: input, shape index: {}]   ;;  %s2449_s7 = inlined_call_operand.vmem [shape: f32[1,32], index: 7, kind: input, shape index: {}]   ;;  %s2450_s8 = inlined_call_operand.vmem [shape: f32[1,32], index: 8, kind: input, shape index: {}]   ;;  %s2451_s9 = inlined_call_operand.vmem [shape: f32[1,32], index: 9, kind: input, shape index: {}]   ;;  %s2452_s10 = inlined_call_operand.hbm [shape: bf16[32,64], index: 10, kind: input, shape index: {}]   ;;  %s2453_s11 = inlined_call_operand.vmem [shape: f32[1,64], index: 11, kind: input, shape index: {}]   ;;  %s2454_s12 = inlined_call_operand.vmem [shape: bf16[64,32], index: 12, kind: input, shape index: {}]   ;;  %s2455_s13 = inlined_call_operand.vmem [shape: f32[1,32], index: 13, kind: input, shape index: {}]   ;;  %s2456_s14 = inlined_call_operand.vmem [shape: f32[1,32], index: 14, kind: input, shape index: {}]   ;;  %s2457_s15 = inlined_call_operand.vmem [shape: f32[1,32], index: 15, kind: input, shape index: {}]   ;;  %s2458_s16 = inlined_call_operand.hbm [shape: f32[2,8,32], index: 16, kind: output, shape index: {}]  }
   0x1   :  { %2464 = sst [smem:[#allocation17_spill]] %s2442_s0 }
   0x2   :  { %2465 = sst [smem:[#allocation18_spill]] %s2443_s1 }
   0x3   :  { %2466 = sst [smem:[#allocation19_spill]] %s2448_s6 }
   0x4   :  { %2467 = sst [smem:[#allocation20_spill]] %s2452_s10 }
   0x5   :  { %2468 = sst [smem:[#allocation21_spill]] %s2453_s11 }
   0x6   :  { %2469 = sst [smem:[#allocation22_spill]] %s2455_s13 }
   0x7   :  { %2470 = sst [smem:[#allocation23_spill]] %s2456_s14 }
   0x8   :  { %2471 = sst [smem:[#allocation24_spill]] %s2457_s15 }
   0x9   :  { %2472 = sst [smem:[#allocation25_spill]] %s2458_s16 }
   0xa   :  { %21 = vsyncpa [#allocation5], 0 }
   0xb   :  { %23 = vsyncpa [#allocation5 + $0x1], 0 }
   0xc   :  { %24 = vsyncpa [#allocation8], 0 }
   0xd   :  { %25 = vsyncpa [#allocation6], 0 }
   0xe   :  { %27 = vsyncpa [#allocation6 + $0x1], 0  ;;  %s2110_s21 = smov 0   ;;  %s2112_s22 = smov 0  }
   0xf   :  { %s2114_s23 = smov 0   ;;  %s2116_s24 = smov 0  }
  0x10   :  { %s2118_s25 = smov 0   ;;  %s2120_s26 = smov 0  }
  0x11 LB: > { %2473 = sst [smem:[#allocation14_spill]] %s1989_s21  ;;  %s2459_s27 = sadd.s32 4294967295, %s2009_s26   ;;  %s2009_s26 = sphi %s2120_s26, %s33_s26   ;;  %s2005_s25 = sphi %s2118_s25, %s2493_s25   ;;  %s2001_s24 = sphi %s2116_s24, %s2492_s24   ;;  %s1997_s23 = sphi %s2114_s23, %s2496_s23   ;;  %s1993_s22 = sphi %s2112_s22, %s2495_s22   ;;  %s1989_s21 = sphi %s2110_s21, %s2494_s21  }
  0x12   : > { %2474 = sst [smem:[#allocation15_spill]] %s2005_s25  ;;  %p1603_p0 = scmp.ge.s32.totalorder %s2009_s26, 1 }
  0x13   : > { %p2144_p1 = scmp.eq.s32.totalorder %s2459_s27, 0  ;;  %p426_p2 = scmp.lt.s32.totalorder %s2009_s26, 3 }
  0x14   : > { %s2476_s6 = sld [smem:[#allocation19_spill]]  ;;  %s2011_s18 = smov [#allocation7]  }
  0x15   : > { %p2152_p3 = pnand %p1603_p0, %p426_p2  ;;  %s451_s19 = sshll.u32 %s2011_s18, 4  ;;  %s452_s19 = int_to_ptr.vmem [resolvable:$true] %s451_s19 }
  0x16   : > { %p1606_p6 = scmp.ge.s32.totalorder %s2009_s26, 2  ;;  %s2478_s10 = sld [smem:[#allocation20_spill]] }
  0x17   : > { %p1704_p4 = pneg %p2152_p3  ;;  %s2012_s27 = smov 64  }
  0x18   : > { %s2014_s18 = smov [#allocation9]   ;;  %s45_s16 = sadd.s32 1, %s2005_s25 }
  0x19   : > { %p1705_p5 = pnand %p1704_p4, %p2144_p1  ;;  %s474_s15 = sshll.u32 %s2014_s18, 4  ;;  %s475_s15 = int_to_ptr.vmem [resolvable:$true] %s474_s15 }
  0x1a   : > { %s449_s0 = sshll.u32 %s2476_s6, 4  ;;  %s2013_s6 = smov 4   ;;  %s450_s0 = int_to_ptr.hbm [resolvable:$true] %s449_s0 }
  0x1b   : > { %1707 = dma.hbm_to_vmem [thread:$0]  (!%p1705_p5), %s450_s0, 256, %s452_s19, [#allocation8], %s2012_s27, %s2012_s27, %s2013_s6  }
  0x1c   : > { %s472_s30 = sshll.u32 %s2478_s10, 4  ;;  %s1602_s14 = sadd.s32 4294967294, %s2009_s26   ;;  %s473_s30 = int_to_ptr.hbm [resolvable:$true] %s472_s30 }
  0x1d   : > { %1710 = dma.hbm_to_vmem [thread:$0]  (!%p1705_p5), %s473_s30, 256, %s475_s15, [#allocation8], %s2012_s27, %s2012_s27, %s2013_s6  }
  0x1e   : > { %p47_p7 = scmp.ge.s32.totalorder %s45_s16, 2  ;;  %s80_s20 = sadd.s32 1, %s1997_s23 }
  0x1f   : > { %p87_p8 = scmp.ne.s32.totalorder %s1997_s23, %s1993_s22  ;;  %p88_p9 = scmp.eq.s32.totalorder %s2009_s26, 0 }
  0x20   : > { %s2498_s16 = smov (%p47_p7, %s45_s16), 0  ;;  %p93_p10 = scmp.ne.s32.totalorder %s1993_s22, %s1989_s21 }
  0x21   : > { %2479 = sst [smem:[#allocation16_spill]] %s2498_s16  ;;  %s77_s0 = ssub.s32 %s2005_s25, %s2498_s16 }
  0x22   : > { %s2480_s19 = sadd.s32 4294967295, %s2009_s26   ;;  %p78_p12 = scmp.eq.s32.totalorder %s77_s0, 0 }
  0x23   : > { %p413_p11 = scmp.eq.s32.totalorder %s2480_s19, 1  ;;  %p2180_p13 = por %p2144_p1, %p93_p10 }
  0x24   : > { %p419_p2 = scmp.eq.s32.totalorder %s1602_s14, 1  ;;  %p89_p4 = por %p88_p9, %p87_p8 }
  0x25   : > { %p2184_p0 = por %p413_p11, %p87_p8  ;;  %s513_s30 = sand.u32 1, %s1997_s23  }
  0x26   : > { %s2189_s27 = scalar_select %p78_p12, %s1997_s23, %s80_s20  }
  0x27   : > { %p2191_p5 = por %p419_p2, %p93_p10  ;;  %s1608_s18 = sshll.u32 %s2005_s25, 2 }
  0x28   : > { %p1721_p7 = scmp.lt.s32.totalorder %s2009_s26, 2  ;;  %s1607_s0 = sshll.u32 %s513_s30, 2 }
  0x29   : > { %s2484_s1 = sld [smem:[#allocation18_spill]]  ;;  %s517_s13 = scalar_lea.vmem [#allocation4], %s1607_s0 }
  0x2a   : > { %s525_s11 = sshll.u32 %s517_s13, 4  ;;  %p1712_p11 = pnand %p1721_p7, %p89_p4  ;;  %s526_s11 = int_to_ptr.vmem [resolvable:$true] %s525_s11 }
  0x2b   : > { %s514_s14 = scalar_lea.sflag [#allocation5], %s513_s30  ;;  %s2204_s20 = sand.u32 (!%p2152_p3), 1, %s1993_s22  }
  0x2c   : > { %s1610_s25 = sshll.u32 (!%p2152_p3), %s2204_s20, 2  ;;  %s537_s10 = scalar_lea.sflag (!%p2152_p3), [#allocation5], %s2204_s20 }
  0x2d   : > { %534 = sbr.rel (%p2152_p3) target bundleno = 2010 (0x7da), region = 84 }
  0x2f   : > { %s521_s16 = scalar_lea.hbm %s2484_s1, %s1608_s18  ;;  %s540_s18 = scalar_lea.vmem (!%p2152_p3), [#allocation4], %s1610_s25 }
  0x30   : > { %s523_s21 = sshll.u32 %s521_s16, 4  ;;  %s524_s21 = int_to_ptr.hbm [resolvable:$true] %s523_s21 }
  0x31   : > { %1714 = dma.hbm_to_vmem [thread:$0]  (!%p1712_p11), %s524_s21, 64, %s526_s11, %s514_s14  }
  0x32   : > { %1976 = dma.done.wait (%p2180_p13), %s537_s10, 64  }
  0x33   : > { %1978 = vsyncadd (%p2180_p13), %s537_s10, 4294967232 }
  0x34   : > { %1980 = dma.done.wait (%p2144_p1), [#allocation8], 512  }
  0x35   : > { %1982 = vsyncadd (%p2144_p1), [#allocation8], 4294966784  ;;  %p607_p3 = scmp.lt.s32.totalorder %s2001_s24, 1  ;;  %s2485_s17 = sld [smem:[#allocation17_spill]]  ;;  %v1681_v0 = vld [vmem:[%s2446_s4 + $0x8] sm:$0xff]  ;;  %v1680_v2 = vld [vmem:[%s2446_s4] sm:$0xff] }
  0x36   : > { %v1683_v1 = vld [vmem:[%s2444_s2 + $0x8] sm:$0xff]  ;;  %v1682_v3 = vld [vmem:[%s2444_s2] sm:$0xff]  ;;  %651 = vmatpush.bf16.msra.mxu0 %v1681_v0  ;;  %vm641_vm0 = vcmask 261120   ;;  %vm659_vm1 = vcmask 257024   ;;  %s2016_s21 = smov 120   ;;  %vm919_vm2 = vcmask 1043456  }
  0x37   : > { %s608_s11 = scalar_select %p607_p3, %s2001_s24, 1  ;;  %697 = vmatpush.bf16.msra.mxu1 %v1683_v1  ;;  %v620_v6 = vld [vmem:[%s540_s18] sm:$0xf]  ;;  %v1794_v7 = vld [vmem:[%s2447_s5] ss:$0 sm:$0xff]  ;;  %vm715_vm3 = vcmask 1047556  }
  0x38   : > { %v1795_v8 = vld [vmem:[%s2445_s3] ss:$0 sm:$0xff]  ;;  %s2015_s18 = smov 104   ;;  %v2019_v25 = vmov 1983009808   ;;  %vm915_vm4 = vcmask 64512  }
  0x39   : > { %s1614_s13 = sshll.u32 %s608_s11, 3  ;;  %v720_v26 = vunpack.c.l.s4 %v2019_v25  ;;  %v2020_v39 = vmov 1934713408   ;;  %s2021_s30 = smov 16   ;;  %vm1264_vm5 = vcmask 130048   ;;  %vm1266_vm6 = vcmask 195584  }
  0x3a   : > { %652 = vmatpush.bf16.msra.mxu0 %v1680_v2  ;;  %v744_v40 = vunpack.c.l.s4 %v2020_v39  ;;  %s2022_s0 = smov 8   ;;  %s2023_s6 = smov 24   ;;  %vm1420_vm11 = vcmask 523264  }
  0x3b   : > { %s613_s25 = scalar_lea.vmem %s2485_s17, %s1614_s13  ;;  %698 = vmatpush.bf16.msra.mxu1 %v1682_v3  ;;  %s2017_s17 = smov 112   ;;  %v2257_v31 = vunpack.c.0.s8 %v720_v26 }
  0x3c   : > { %v2233_v4 = vld [vmem:[%s613_s25] sm:$0xff]  ;;  %s2018_s25 = smov 96   ;;  %v2266_v45 = vunpack.c.0.s8 %v744_v40  ;;  %s2486_s14 = sld [smem:[#allocation21_spill]] }
  0x3d   : > { %v666_v5 = vpack.c.bf16 %v2233_v4, %v2233_v4  ;;  %1623 = vmatmul.msk.bf16.vlgmr.msra.gmra.mxu0 %vm641_vm0, %v620_v6  ;;  %s2487_s11 = sld [smem:[#allocation22_spill]]  ;;  %s1613_s13 = sshll.u32 %s2204_s20, 3 }
  0x3e   : > { %s1677_s1 = sshll.u32 %s2001_s24, 3  ;;  %s606_s24 = scalar_lea.vmem [#allocation10], %s1613_s13 }
  0x3f   : > { %1632 = vmatmul.msk.bf16.vlgmr.msra.gmra.mxu1 %vm641_vm0, %v666_v5  ;;  %s1485_s28 = sshll.u32 %s606_s24, 4  ;;  %s1486_s28 = int_to_ptr.vmem [resolvable:$true] %s1485_s28 }
  0xba   : > { %v654_v9 = vpop.f32.mrf.mxu0 }
  0xbb   : > { %v655_v11 = vadd.f32 %v1794_v7, %v654_v9 }
  0xbc   : > { %v700_v10 = vpop.f32.mrf.mxu1 }
  0xbd   : > { %v701_v12 = vadd.f32 %v1795_v8, %v700_v10  ;;  %v658_v13 = vpack.c.bf16 %v655_v11, %v655_v11 }
  0xbf   : > { %711 = vrot.lane.b32.xlu1 %v701_v12, %s2015_s18  ;;  %705 = vrot.lane.b32.xlu0 %v701_v12, %s2016_s21  ;;  %660 = vst.msk [vmem:[#allocation2] sm:$0xf] %vm659_vm1, %v658_v13  ;;  %v717_v28 = vrot.slane %v701_v12, 4 }
  0xc2   : > { %v656_v14 = vpop.f32.mrf.mxu0 }
  0xc4   : > { %v702_v15 = vpop.f32.mrf.mxu1 }
  0xc6   : > { %v779_v16 = vld [vmem:[#allocation2] sm:$0xf] }
  0xc7   : > { %708 = vrot.lane.b32.xlu0 %v701_v12, %s2017_s17  ;;  %784 = vrot.lane.b32.xlu2 %v779_v16, %s2017_s17 }
  0xc8   : > { %781 = vrot.lane.b32.xlu1 %v779_v16, %s2016_s21 }
  0xcf   : > { %787 = vrot.lane.b32.xlu2 %v779_v16, %s2015_s18 }
  0xd7   : > { %662 = vrot.lane.b32.xlu2 %v658_v13, %s2018_s25 }
 0x121   : > { %v785_v17 = vpop.permute.xlu2 %784 }
 0x129   : > { %v788_v18 = vpop.permute.xlu2 %787 }
 0x12a   : > { %1791 = vxpose.binary.xlu1.c.b16.start.end [1/2] (short) (narrow) %v788_v18, %v785_v17, 16 }
 0x131   : > { %v712_v19 = vpop.permute.xlu1 %711  ;;  %v663_v20 = vpop.permute.xlu2 %662 }
 0x132   : > { %665 = vst.msk [vmem:[#allocation3] sm:$0xf] %vm659_vm1, %v663_v20  ;;  %v706_v24 = vpop.permute.xlu0 %705  ;;  %v727_v35 = vrot.slane %v712_v19, 4 }
 0x133   : > { %v729_v32 = vrot.slane %v706_v24, 4 }
 0x134   : > { %v728_v42 = vsel %vm715_vm3, %v727_v35, %v706_v24 }
 0x135   : > { %v730_v36 = vsel %vm715_vm3, %v712_v19, %v729_v32  ;;  %v734_v46 = vperm.slane %v728_v42, %v2257_v31 }
 0x136   : > { %v738_v41 = vperm.slane %v730_v36, %v2257_v31 }
 0x137   : > { %v739_v53 = vrot.slane %v734_v46, 4 }
 0x138   : > { %v751_v48 = vrot.slane %v738_v41, 4 }
 0x139   : > { %v2251_v22 = vld [vmem:[#allocation3] sm:$0xf] }
 0x13a   : > { %v782_v21 = vpop.permute.xlu1 %781  ;;  %v1057_v23 = vsel %vm919_vm2, %v2251_v22, 0  ;;  %v709_v27 = vpop.permute.xlu0 %708 }
 0x13b   : > { %1788 = vxpose.binary.xlu0.c.b16.start.end [1/2] (short) (narrow) %v782_v21, %v779_v16, 16  ;;  %v714_v29 = vrot.slane %v709_v27, 4  ;;  %v718_v30 = vsel %vm715_vm3, %v709_v27, %v717_v28 }
 0x13c   : > { %1066 = vmatpush.bf16.msrb.mxu0 %v1057_v23  ;;  %v726_v33 = vperm.slane %v718_v30, %v2257_v31 }
 0x13d   : > { %v716_v34 = vsel %vm715_vm3, %v714_v29, %v701_v12 }
 0x13e   : > { %v722_v37 = vperm.slane %v716_v34, %v2257_v31  ;;  %v753_v38 = vrot.slane %v726_v33, 4  ;;  %v752_v50 = vsel %vm715_vm3, %v751_v48, %v726_v33 }
 0x13f   : > { %v758_v54 = vperm.slane %v752_v50, %v2266_v45 }
 0x140   : > { %v741_v43 = vrot.slane %v722_v37, 4  ;;  %v754_v44 = vsel %vm715_vm3, %v738_v41, %v753_v38  ;;  %v740_v55 = vsel %vm715_vm3, %v739_v53, %v722_v37 }
 0x141   : > { %v762_v47 = vperm.slane %v754_v44, %v2266_v45  ;;  %v746_v58 = vperm.slane %v740_v55, %v2266_v45  ;;  %v767_v59 = vrot.slane %v758_v54, 4  ;;  %v775_v8 = vpack.c.bf16 %v758_v54, %v758_v54 }
 0x142   : > { %v742_v49 = vsel %vm715_vm3, %v734_v46, %v741_v43 }
 0x143   : > { %v750_v51 = vperm.slane %v742_v49, %v2266_v45  ;;  %v769_v52 = vrot.slane %v762_v47, 4  ;;  %v777_v62 = vpack.c.bf16 %v762_v47, %v762_v47  ;;  %v763_v63 = vrot.slane %v746_v58, 4 }
 0x144   : > { %v768_v0 = vsel %vm715_vm3, 0.0, %v767_v59  ;;  %v771_v14 = vpack.c.bf16 %v746_v58, %v746_v58  ;;  %v798_v15 = vrot.slane %v775_v8, 4 }
 0x145   : > { %v765_v56 = vrot.slane %v750_v51, 4  ;;  %v770_v57 = vsel %vm715_vm3, 0.0, %v769_v52  ;;  %v773_v3 = vpack.c.bf16 %v750_v51, %v750_v51  ;;  %v776_v5 = vpack.c.bf16 %v768_v0, %v768_v0 }
 0x146   : > { %v778_v60 = vpack.c.bf16 %v770_v57, %v770_v57  ;;  %v805_v6 = vrot.slane %v777_v62, 4  ;;  %v764_v7 = vsel %vm715_vm3, 0.0, %v763_v63  ;;  %v800_v19 = vsel %vm715_vm3, %v798_v15, %v771_v14 }
 0x147   : > { %v766_v61 = vsel %vm715_vm3, 0.0, %v765_v56  ;;  %v772_v10 = vpack.c.bf16 %v764_v7, %v764_v7  ;;  %v819_v11 = vrot.slane %v776_v5, 4  ;;  %v804_v24 = vperm.slane %v800_v19, %v2257_v31 }
 0x148   : > { %v774_v1 = vpack.c.bf16 %v766_v61, %v766_v61  ;;  %v825_v2 = vrot.slane %v778_v60, 4  ;;  %v806_v12 = vsel %vm715_vm3, %v805_v6, %v773_v3 }
 0x149   : > { %v810_v16 = vperm.slane %v806_v12, %v2257_v31  ;;  %v820_v17 = vsel %vm715_vm3, %v819_v11, %v772_v10 }
 0x14a   : > { %v826_v9 = vsel %vm715_vm3, %v825_v2, %v774_v1  ;;  %v824_v21 = vperm.slane %v820_v17, %v2257_v31 }
 0x14b   : > { %v830_v13 = vperm.slane %v826_v9, %v2257_v31  ;;  %v811_v20 = vrot.slane %v810_v16, 4 }
 0x14d   : > { %v831_v18 = vrot.slane %v830_v13, 4  ;;  %v812_v26 = vsel %vm715_vm3, %v811_v20, %v804_v24 }
 0x14e   : > { %v816_v32 = vperm.slane %v812_v26, %v2266_v45 }
 0x14f   : > { %v832_v25 = vsel %vm715_vm3, %v831_v18, %v824_v21 }
 0x150   : > { %v836_v27 = vperm.slane %v832_v25, %v2266_v45  ;;  %v842_v39 = vshrl.u32 %v816_v32, 16  ;;  %v817_v42 = vrot.slane %v816_v32, 4 }
 0x152   : > { %v841_v33 = vpack.i.b16 %v836_v27, %v816_v32  ;;  %v843_v35 = vshrl.u32 %v836_v27, 16  ;;  %v837_v41 = vrot.slane %v836_v27, 4  ;;  %v818_v47 = vsel %vm715_vm3, 0, %v817_v42 }
 0x153   : > { %v848_v50 = vshrl.u32 %v818_v47, 16 }
 0x154   : > { %v844_v40 = vpack.i.b16 %v843_v35, %v842_v39  ;;  %v838_v44 = vsel %vm715_vm3, 0, %v837_v41 }
 0x155   : > { %v847_v48 = vpack.i.b16 %v838_v44, %v818_v47  ;;  %v849_v49 = vshrl.u32 %v838_v44, 16 }
 0x157   : > { %v850_v51 = vpack.i.b16 %v849_v49, %v848_v50 }
 0x184   : > { %794 = vrot.lane.b32.xlu1 %v2251_v22, %s2017_s17 }
 0x1d6   : > { %v1792_v23 = vpop.trf.xlu1 }
 0x1d7   : > { %v959_v29 = vsel %vm919_vm2, %v1792_v23, 0 }
 0x1de   : > { %v1793_v34 = vpop.trf.xlu1 }
 0x1df   : > { %v978_v37 = vsel %vm919_vm2, %v1793_v34, 0 }
 0x1e7   : > { %v1789_v28 = vpop.trf.xlu0 }
 0x1e8   : > { %v921_v30 = vsel %vm919_vm2, %v1789_v28, 0 }
 0x1e9   : > { %930 = vmatpush.bf16.msra.mxu2 %v921_v30 }
 0x1ec   : > { %1633 = vmatmul.msk.bf16.vlgmr.msra.gmra.mxu2 %vm915_vm4, %v841_v33 }
 0x1ed   : > { %968 = vmatpush.bf16.msrb.mxu2 %v959_v29 }
 0x1ef   : > { %v1790_v36 = vpop.trf.xlu0 }
 0x1f0   : > { %v940_v38 = vsel %vm919_vm2, %v1790_v36, 0 }
 0x1f1   : > { %949 = vmatpush.bf16.msra.mxu3 %v940_v38 }
 0x1f4   : > { %1634 = vmatmul.msk.bf16.vlgmr.msra.gmra.mxu3 %vm915_vm4, %v844_v40 }
 0x1f5   : > { %987 = vmatpush.bf16.msrb.mxu3 %v978_v37 }
 0x1f6   : > { %v795_v43 = vpop.permute.xlu1 %794 }
 0x1f7   : > { %v1095_v46 = vsel %vm919_vm2, %v795_v43, 0 }
 0x1f8   : > { %1104 = vmatpush.bf16.msra.mxu2 %v1095_v46 }
 0x1fc   : > { %1635 = vmatmul.msk.bf16.vlgmr.msrb.gmra.mxu2 %vm915_vm4, %v847_v48 }
 0x204   : > { %1636 = vmatmul.msk.bf16.vlgmr.msrb.gmra.mxu3 %vm915_vm4, %v850_v51 }
 0x26f   : > { %v932_v52 = vpop.f32.mrf.mxu2 }
 0x270   : > { %v993_v61 = vsel %vm915_vm4, %v932_v52, -inf }
 0x277   : > { %v934_v53 = vpop.f32.mrf.mxu2  ;;  %v951_v54 = vpop.f32.mrf.mxu3 }
 0x278   : > { %v996_v63 = vsel %vm915_vm4, %v951_v54, -inf }
 0x27f   : > { %v953_v55 = vpop.f32.mrf.mxu3  ;;  %v970_v56 = vpop.f32.mrf.mxu2 }
 0x280   : > { %v999_v57 = vsel %vm915_vm4, %v970_v56, -inf }
 0x281   : > { %1000 = vmax.xlane.f32.xlu2 %v999_v57 }
 0x287   : > { %v972_v58 = vpop.f32.mrf.mxu2  ;;  %v989_v59 = vpop.f32.mrf.mxu3 }
 0x288   : > { %v1002_v60 = vsel %vm915_vm4, %v989_v59, -inf }
 0x289   : > { %1003 = vmax.xlane.f32.xlu0 %v1002_v60  ;;  %994 = vmax.xlane.f32.xlu2 %v993_v61 }
 0x28f   : > { %v991_v62 = vpop.f32.mrf.mxu3 }
 0x291   : > { %997 = vmax.xlane.f32.xlu2 %v996_v63 }
 0x2a9   : > { %796 = vrot.lane.b32.xlu2 %v2251_v22, %s2015_s18 }
 0x2b1   : > { %792 = vrot.lane.b32.xlu2 %v2251_v22, %s2016_s21  ;;  %s2488_s21 = sld [smem:[#allocation23_spill]] }
 0x2f4   : > { %v1001_v0 = vpop.xlane.xlu2 %1000 }
 0x2f5   : > { %v1019_v1 = vsub.f32 %v970_v56, %v1001_v0  ;;  %v1007_v32 = vsub.f32 -inf, %v1001_v0 }
 0x2f7   : > { %v1025_v2 = vmul.f32 1.442695, %v1019_v1  ;;  %v1013_v33 = vmul.f32 1.442695, %v1007_v32 }
 0x2f9   : > { %1803 = vpow2.f32 %v1025_v2 }
 0x2fc   : > { %v1004_v3 = vpop.xlane.xlu0 %1003  ;;  %v995_v5 = vpop.xlane.xlu2 %994 }
 0x2fd   : > { %v1020_v6 = vsub.f32 %v989_v59, %v1004_v3  ;;  %v1017_v7 = vsub.f32 %v932_v52, %v995_v5  ;;  %v1005_v29 = vsub.f32 -inf, %v995_v5  ;;  %v1008_v34 = vsub.f32 -inf, %v1004_v3 }
 0x2ff   : > { %v1027_v8 = vmul.f32 1.442695, %v1020_v6  ;;  %v1804_v9 = vpop.eup %1803  ;;  %v1021_v10 = vmul.f32 1.442695, %v1017_v7  ;;  %v1009_v30 = vmul.f32 1.442695, %v1005_v29 }
 0x300   : > { %v1051_v11 = vpack.c.bf16 %v1804_v9, %v1804_v9  ;;  %v1039_v23 = vsel %vm915_vm4, %v1804_v9, 0.0  ;;  %v1015_v36 = vmul.f32 1.442695, %v1008_v34 }
 0x301   : > { %1805 = vpow2.f32 %v1027_v8 }
 0x302   : > { %1639 = vmatmul.msk.bf16.vlgmr.msra.gmra.mxu2 %vm915_vm4, %v1051_v11  ;;  %1807 = vpow2.f32 %v1021_v10 }
 0x304   : > { %v998_v12 = vpop.xlane.xlu2 %997 }
 0x305   : > { %v1018_v13 = vsub.f32 %v951_v54, %v998_v12  ;;  %v1006_v37 = vsub.f32 -inf, %v998_v12 }
 0x307   : > { %v1806_v14 = vpop.eup %1805  ;;  %v1023_v16 = vmul.f32 1.442695, %v1018_v13  ;;  %v1011_v40 = vmul.f32 1.442695, %v1006_v37 }
 0x308   : > { %v1042_v22 = vsel %vm915_vm4, %v1806_v14, 0.0  ;;  %v1808_v15 = vpop.eup %1807  ;;  %v1052_v21 = vpack.c.bf16 %v1806_v14, %v1806_v14 }
 0x309   : > { %1043 = vadd.xlane.f32.xlu1 %v1042_v22  ;;  %v1033_v17 = vsel %vm915_vm4, %v1808_v15, 0.0  ;;  %v1049_v18 = vpack.c.bf16 %v1808_v15, %v1808_v15  ;;  %1809 = vpow2.f32 %v1023_v16 }
 0x30a   : > { %1034 = vadd.xlane.f32.xlu2 %v1033_v17  ;;  %1811 = vpow2.f32 %v1009_v30 }
 0x30b   : > { %1637 = vmatmul.msk.bf16.vlgmr.msrb.gmra.mxu0 %vm915_vm4, %v1049_v18  ;;  %1813 = vpow2.f32 %v1013_v33 }
 0x30c   : > { %v797_v19 = vpop.permute.xlu2 %796  ;;  %1815 = vpow2.f32 %v1015_v36 }
 0x30d   : > { %v1114_v20 = vsel %vm919_vm2, %v797_v19, 0  ;;  %1817 = vpow2.f32 %v1011_v40 }
 0x30e   : > { %1123 = vmatpush.bf16.msra.mxu3 %v1114_v20 }
 0x30f   : > { %v1810_v24 = vpop.eup %1809 }
 0x310   : > { %v1050_v27 = vpack.c.bf16 %v1810_v24, %v1810_v24  ;;  %v1036_v28 = vsel %vm915_vm4, %v1810_v24, 0.0  ;;  %v1812_v35 = vpop.eup %1811 }
 0x311   : > { %1640 = vmatmul.msk.bf16.vlgmr.msra.gmra.mxu3 %vm915_vm4, %v1052_v21  ;;  %v1029_v39 = vmul.f32 0.0, %v1812_v35  ;;  %v1814_v42 = vpop.eup %1813 }
 0x312   : > { %1040 = vadd.xlane.f32.xlu2 %v1039_v23  ;;  %v1031_v43 = vmul.f32 0.0, %v1814_v42  ;;  %v1816_v46 = vpop.eup %1815 }
 0x313   : > { %v1032_v50 = vmul.f32 0.0, %v1816_v46  ;;  %v1818_v52 = vpop.eup %1817 }
 0x314   : > { %v793_v25 = vpop.permute.xlu2 %792  ;;  %v1030_v57 = vmul.f32 0.0, %v1818_v52 }
 0x315   : > { %v1076_v26 = vsel %vm919_vm2, %v793_v25, 0 }
 0x316   : > { %1085 = vmatpush.bf16.msrb.mxu1 %v1076_v26 }
 0x319   : > { %1638 = vmatmul.msk.bf16.vlgmr.msrb.gmra.mxu1 %vm915_vm4, %v1050_v27 }
 0x31a   : > { %1037 = vadd.xlane.f32.xlu2 %v1036_v28 }
 0x37c   : > { %v1044_v49 = vpop.xlane.xlu1 %1043 }
 0x37d   : > { %v1035_v38 = vpop.xlane.xlu2 %1034  ;;  %v1048_v55 = vadd.f32 %v1044_v49, %v1032_v50 }
 0x37e   : > { %v1045_v41 = vadd.f32 %v1035_v38, %v1029_v39 }
 0x380   : > { %1819 = vrcp.f32 %v1045_v41 }
 0x385   : > { %v1106_v44 = vpop.f32.mrf.mxu2  ;;  %v1041_v47 = vpop.xlane.xlu2 %1040 }
 0x386   : > { %v1047_v48 = vadd.f32 %v1041_v47, %v1031_v43  ;;  %v1820_v54 = vpop.eup %1819  ;;  %v1131_v59 = vadd.f32 %v1106_v44, %v1031_v43 }
 0x388   : > { %1821 = vrcp.f32 %v1047_v48  ;;  %v1068_v51 = vpop.f32.mrf.mxu0 }
 0x389   : > { %v1129_v53 = vadd.f32 %v1068_v51, %v1029_v39  ;;  %1823 = vrcp.f32 %v1048_v55 }
 0x38b   : > { %v1137_v56 = vmul.f32 %v1820_v54, %v1129_v53 }
 0x38d   : > { %v1108_v58 = vpop.f32.mrf.mxu2  ;;  %v1038_v60 = vpop.xlane.xlu2 %1037  ;;  %v1143_v0 = vrot.slane %v1137_v56, 4 }
 0x38e   : > { %v1822_v61 = vpop.eup %1821  ;;  %v1046_v62 = vadd.f32 %v1038_v60, %v1030_v57 }
 0x38f   : > { %v1139_v63 = vmul.f32 %v1822_v61, %v1131_v59  ;;  %v1824_v8 = vpop.eup %1823 }
 0x390   : > { %1825 = vrcp.f32 %v1046_v62  ;;  %v1070_v1 = vpop.f32.mrf.mxu0 }
 0x391   : > { %v1141_v2 = vrot.slane %v1139_v63, 4  ;;  %v1144_v3 = vsel %vm715_vm3, %v1139_v63, %v1143_v0 }
 0x392   : > { %v1152_v15 = vperm.slane %v1144_v3, %v2257_v31 }
 0x393   : > { %v1142_v6 = vsel %vm715_vm3, %v1141_v2, %v1137_v56 }
 0x394   : > { %v1125_v5 = vpop.f32.mrf.mxu3  ;;  %v1148_v13 = vperm.slane %v1142_v6, %v2257_v31  ;;  %v1179_v23 = vrot.slane %v1152_v15, 4 }
 0x395   : > { %v1132_v7 = vadd.f32 %v1125_v5, %v1032_v50 }
 0x396   : > { %v1087_v9 = vpop.f32.mrf.mxu1  ;;  %v1826_v12 = vpop.eup %1825  ;;  %v1167_v18 = vrot.slane %v1148_v13, 4 }
 0x397   : > { %v1140_v10 = vmul.f32 %v1824_v8, %v1132_v7  ;;  %v1130_v11 = vadd.f32 %v1087_v9, %v1030_v57 }
 0x399   : > { %v1153_v14 = vrot.slane %v1140_v10, 4  ;;  %v1138_v22 = vmul.f32 %v1826_v12, %v1130_v11  ;;  %v1685_v12 = vld [vmem:[#allocation7 + $0x8] sm:$0xff] }
 0x39a   : > { %1298 = vmatpush.bf16.msra.mxu0 %v1685_v12 }
 0x39b   : > { %v1154_v16 = vsel %vm715_vm3, %v1153_v14, %v1138_v22  ;;  %v1155_v17 = vrot.slane %v1138_v22, 4 }
 0x39c   : > { %v1160_v19 = vperm.slane %v1154_v16, %v2257_v31  ;;  %v1127_v20 = vpop.f32.mrf.mxu3 }
 0x39d   : > { %v1156_v21 = vsel %vm715_vm3, %v1140_v10, %v1155_v17 }
 0x39e   : > { %v1164_v24 = vperm.slane %v1156_v21, %v2257_v31  ;;  %v1165_v25 = vrot.slane %v1160_v19, 4  ;;  %v1168_v26 = vsel %vm715_vm3, %v1160_v19, %v1167_v18  ;;  %v1089_v27 = vpop.f32.mrf.mxu1  ;;  %v1796_v19 = vld [vmem:[%s2449_s7] ss:$0 sm:$0xff] }
 0x39f   : > { %v1176_v28 = vperm.slane %v1168_v26, %v2266_v45  ;;  %v2024_v26 = vmov 32.0  }
 0x3a0   : > { %v1166_v29 = vsel %vm715_vm3, %v1165_v25, %v1148_v13  ;;  %v1177_v30 = vrot.slane %v1164_v24, 4  ;;  %v1180_v32 = vsel %vm715_vm3, %v1164_v24, %v1179_v23  ;;  %v1684_v13 = vld [vmem:[#allocation7] sm:$0xff]  ;;  %1827 = vrcp.f32 %v2024_v26 }
 0x3a1   : > { %v1172_v33 = vperm.slane %v1166_v29, %v2266_v45  ;;  %v1188_v34 = vperm.slane %v1180_v32, %v2266_v45  ;;  %v1191_v35 = vrot.slane %v1176_v28, 4  ;;  %1299 = vmatpush.bf16.msra.mxu0 %v1684_v13 }
 0x3a2   : > { %v1178_v36 = vsel %vm715_vm3, %v1177_v30, %v1152_v15 }
 0x3a3   : > { %v1184_v37 = vperm.slane %v1178_v36, %v2266_v45  ;;  %v1192_v38 = vsel %vm715_vm3, 0.0, %v1191_v35  ;;  %v1195_v39 = vrot.slane %v1188_v34, 4  ;;  %v1189_v40 = vrot.slane %v1172_v33, 4 }
 0x3a4   : > { %v1202_v41 = vrot.slane %v1192_v38, 4  ;;  %v1197_v42 = vsel %vm715_vm3, %v1191_v35, %v1172_v33 }
 0x3a5   : > { %v1196_v43 = vsel %vm715_vm3, 0.0, %v1195_v39  ;;  %v1190_v44 = vsel %vm715_vm3, 0.0, %v1189_v40  ;;  %v1193_v46 = vrot.slane %v1184_v37, 4  ;;  %v1201_v47 = vperm.slane %v1197_v42, %v2257_v31  ;;  %v1691_v40 = vld [vmem:[%s2454_s12 + $0x18] sm:$0xff] }
 0x3a6   : > { %v1213_v48 = vrot.slane %v1196_v43, 4  ;;  %v1203_v49 = vsel %vm715_vm3, %v1202_v41, %v1190_v44  ;;  %v1208_v50 = vsel %vm715_vm3, %v1195_v39, %v1184_v37  ;;  %v1828_v27 = vpop.eup %1827  ;;  %v1686_v39 = vld [vmem:[#allocation9] sm:$0xff]  ;;  %1428 = vmatpush.bf16.msrb.mxu2 %v1691_v40  ;;  %v1690_v43 = vld [vmem:[%s2454_s12 + $0x10] sm:$0xff] }
 0x3a7   : > { %v1194_v51 = vsel %vm715_vm3, 0.0, %v1193_v46  ;;  %v1207_v52 = vperm.slane %v1203_v49, %v2257_v31  ;;  %v1212_v53 = vperm.slane %v1208_v50, %v2257_v31  ;;  %v1221_v54 = vrot.slane %v1201_v47, 4 }
 0x3a8   : > { %v1214_v55 = vsel %vm715_vm3, %v1213_v48, %v1194_v51  ;;  %v1312_v28 = vmul.f32 32.0, %v1828_v27  ;;  %vm1316_vm7 = vweird.f32 %v1828_v27 }
 0x3a9   : > { %v1218_v56 = vperm.slane %v1214_v55, %v2257_v31  ;;  %v1222_v57 = vsel %vm715_vm3, %v1207_v52, %v1221_v54  ;;  %v1233_v58 = vrot.slane %v1212_v53, 4  ;;  %v1219_v59 = vrot.slane %v1207_v52, 4  ;;  %v1797_v52 = vld [vmem:[%s2450_s8] ss:$0 sm:$0xff] }
 0x3aa   : > { %v1230_v60 = vperm.slane %v1222_v57, %v2266_v45  ;;  %v1313_v29 = vsub.f32 1.0, %v1312_v28  ;;  %1429 = vmatpush.bf16.msrb.mxu2 %v1690_v43  ;;  %v1798_v54 = vld [vmem:[%s2451_s9] ss:$0 sm:$0xff] }
 0x3ab   : > { %v1234_v61 = vsel %vm715_vm3, %v1218_v56, %v1233_v58  ;;  %v1220_v62 = vsel %vm715_vm3, %v1219_v59, %v1201_v47  ;;  %v1231_v63 = vrot.slane %v1218_v56, 4  ;;  %v1689_v59 = vld [vmem:[%s2454_s12 + $0x8] sm:$0xff] }
 0x3ac   : > { %v1242_v0 = vperm.slane %v1234_v61, %v2266_v45  ;;  %v1226_v1 = vperm.slane %v1220_v62, %v2266_v45  ;;  %v1249_v2 = vrot.slane %v1230_v60, 4  ;;  %v1314_v30 = vmul.f32 %v1828_v27, %v1313_v29  ;;  %v1799_v61 = vld [vmem:[%s2486_s14] ss:$0 sm:$0xff]  ;;  %s2490_s14 = sld [smem:[#allocation24_spill]] }
 0x3ad   : > { %v1232_v3 = vsel %vm715_vm3, %v1231_v63, %v1212_v53 }
 0x3ae   : > { %v1247_v5 = vrot.slane %v1242_v0, 4  ;;  %v1238_v31 = vperm.slane %v1232_v3, %v2266_v45  ;;  %v1245_v6 = vrot.slane %v1226_v1, 4  ;;  %v1250_v7 = vsel %vm715_vm3, %v1242_v0, %v1249_v2  ;;  %1430 = vmatpush.bf16.msrb.mxu2 %v1689_v59  ;;  %v1800_v3 = vld [vmem:[%s2487_s11] ss:$0 sm:$0xff]  ;;  %s1472_s11 = scalar_lea.sflag [#allocation6], %s2204_s20 }
 0x3af   : > { %v1315_v32 = vadd.f32 %v1828_v27, %v1314_v30 }
 0x3b0   : > { %v1248_v8 = vsel %vm715_vm3, %v1247_v5, %v1230_v60  ;;  %v1243_v9 = vrot.slane %v1238_v31, 4  ;;  %v1246_v10 = vsel %vm715_vm3, %v1238_v31, %v1245_v6  ;;  %v1688_v60 = vld [vmem:[%s2454_s12] sm:$0xff] }
 0x3b1   : > { %1256 = vrot.lane.b32.xlu2 %v1248_v8, %s2021_s30  ;;  %1252 = vrot.lane.b32.xlu0 %v1246_v10, %s2022_s0  ;;  %v1317_v33 = vsel %vm1316_vm7, %v1828_v27, %v1315_v32  ;;  %s2489_s30 = sld [smem:[#allocation25_spill]] }
 0x3b2   : > { %v1244_v11 = vsel %vm715_vm3, %v1243_v9, %v1226_v1  ;;  %1431 = vmatpush.bf16.msrb.mxu2 %v1688_v60 }
 0x3b7   : > { %s1483_s0 = scalar_lea.hbm %s2489_s30, %s1677_s1  ;;  %s1943_s13 = scalar_lea.hbm %s2489_s30, 16 }
 0x3b8   : > { %s1487_s10 = sshll.u32 %s1483_s0, 4  ;;  %s1488_s10 = int_to_ptr.hbm [resolvable:$true] %s1487_s10 }
 0x3b9   : > { %1260 = vrot.lane.b32.xlu0 %v1250_v7, %s2023_s6  ;;  %s1937_s16 = sshra.s32 %s1488_s10, 4  ;;  %s1938_s16 = int_to_ptr.hbm [resolvable:$true] %s1937_s16 }
 0x3ba   : > { %s1939_s1 = scalar_lea.hbm %s1938_s16, 8  ;;  %p1944_p10 = scmp.lt.s32.totalorder %s1938_s16, %s2489_s30 }
 0x3bb   : > { %p1940_p1 = scmp.ne.s32.totalorder %s1938_s16, %s1939_s1  ;;  %p1945_p12 = scmp.lt.s32.totalorder %s1943_s13, %s1939_s1 }
 0x3bd   : > { %p1941_p8 = pnand %p1940_p1, %p2184_p0  ;;  %p1946_p13 = por %p1945_p12, %p1944_p10 }
 0x3bf   : > { %p1942_p9 = pneg %p1941_p8 }
 0x3c1   : > { %p1947_p2 = pnand %p1946_p13, %p1942_p9 }
 0x40b   : > { %v1257_v22 = vpop.permute.xlu2 %1256 }
 0x423   : > { %v1253_v45 = vpop.permute.xlu0 %1252 }
 0x424   : > { %v1263_v14 = vsel %vm915_vm4, %v1244_v11, %v1253_v45 }
 0x425   : > { %v1265_v16 = vsel %vm1264_vm5, %v1263_v14, %v1257_v22 }
 0x42b   : > { %v1261_v15 = vpop.permute.xlu0 %1260 }
 0x42c   : > { %v1267_v17 = vsel %vm1266_vm6, %v1265_v16, %v1261_v15 }
 0x42d   : > { %v1268_v18 = vpack.c.bf16 %v1267_v17, %v1267_v17 }
 0x42f   : > { %1649 = vmatmul.msk.bf16.vlgmr.msra.gmra.mxu0 %vm641_vm0, %v1268_v18 }
 0x4ac   : > { %v1301_v20 = vpop.f32.mrf.mxu0 }
 0x4ad   : > { %v1302_v21 = vadd.f32 %v1796_v19, %v1301_v20 }
 0x4af   : > { %v1305_v23 = vadd.f32 %v1302_v21, %v2233_v4  ;;  %v1687_v4 = vld [vmem:[#allocation9 + $0x8] sm:$0xff]  ;;  %v1801_v21 = vld [vmem:[%s2488_s21] ss:$0 sm:$0xff] }
 0x4b0   : > { %1375 = vmatpush.bf16.msra.mxu1 %v1687_v4 }
 0x4b1   : > { %v1308_v24 = vsel %vm641_vm0, %v1305_v23, 0.0 }
 0x4b2   : > { %1309 = vadd.xlane.f32.xlu0 %v1308_v24 }
 0x4b4   : > { %v1303_v25 = vpop.f32.mrf.mxu0  ;;  %1376 = vmatpush.bf16.msra.mxu1 %v1686_v39 }
 0x4b5   : > { %v1802_v25 = vld [vmem:[%s2490_s14] ss:$0 sm:$0xff] }
 0x525   : > { %v1310_v34 = vpop.xlane.xlu0 %1309 }
 0x526   : > { %v1318_v35 = vmul.f32 %v1317_v33, %v1310_v34 }
 0x528   : > { %v1319_v36 = vsub.f32 %v1305_v23, %v1318_v35 }
 0x52a   : > { %v1320_v37 = vmul.f32 %v1319_v36, %v1319_v36 }
 0x52c   : > { %v1321_v38 = vsel %vm641_vm0, %v1320_v37, 0.0 }
 0x52d   : > { %1322 = vadd.xlane.f32.xlu2 %v1321_v38 }
 0x5a0   : > { %v1323_v41 = vpop.xlane.xlu2 %1322 }
 0x5a1   : > { %v1324_v42 = vmul.f32 %v1323_v41, %v1317_v33 }
 0x5a3   : > { %v1325_v44 = vadd.f32 1e-05, %v1324_v42 }
 0x5a5   : > { %1829 = vrsqrt.f32 %v1325_v44  ;;  %vm1332_vm9 = vweird.f32 %v1325_v44 }
 0x5ab   : > { %v1830_v46 = vpop.eup %1829 }
 0x5ac   : > { %v1327_v47 = vmul.f32 %v1830_v46, %v1325_v44  ;;  %vm1333_vm8 = vweird.f32 %v1830_v46 }
 0x5ad   : > { %vm1334_vm10 = vmor %vm1332_vm9, %vm1333_vm8 }
 0x5ae   : > { %v1328_v48 = vmul.f32 %v1830_v46, %v1327_v47 }
 0x5b0   : > { %v1329_v49 = vmul.f32 0.5, %v1328_v48 }
 0x5b2   : > { %v1330_v50 = vsub.f32 1.5, %v1329_v49 }
 0x5b4   : > { %v1331_v51 = vmul.f32 %v1830_v46, %v1330_v50 }
 0x5b6   : > { %v1335_v53 = vsel %vm1334_vm10, %v1830_v46, %v1331_v51 }
 0x5b7   : > { %v1336_v55 = vmul.f32 %v1335_v53, %v1319_v36 }
 0x5b9   : > { %v1340_v56 = vmul.f32 %v1797_v52, %v1336_v55 }
 0x5bb   : > { %v1344_v57 = vadd.f32 %v1798_v54, %v1340_v56 }
 0x5bd   : > { %v1345_v58 = vpack.c.bf16 %v1344_v57, %v1344_v57 }
 0x5bf   : > { %1658 = vmatmul.msk.bf16.vlgmr.msra.gmra.mxu1 %vm641_vm0, %v1345_v58 }
 0x63c   : > { %v1378_v62 = vpop.f32.mrf.mxu1 }
 0x63d   : > { %v1379_v63 = vadd.f32 %v1799_v61, %v1378_v62 }
 0x63f   : > { %v1382_v0 = vmax.f32 %v1379_v63, 0.0 }
 0x641   : > { %v1383_v1 = vpack.c.bf16 %v1382_v0, %v1382_v0 }
 0x643   : > { %1675 = vmatmul.msk.bf16.vlgmr.msrb.gmra.mxu2 %vm1420_vm11, %v1383_v1 }
 0x644   : > { %v1380_v2 = vpop.f32.mrf.mxu1 }
 0x6c6   : > { %v1433_v5 = vpop.f32.mrf.mxu2 }
 0x6c7   : > { %v1434_v31 = vadd.f32 %v1800_v3, %v1433_v5 }
 0x6c9   : > { %v1437_v6 = vadd.f32 %v1434_v31, %v1344_v57 }
 0x6cb   : > { %v1440_v7 = vsel %vm641_vm0, %v1437_v6, 0.0 }
 0x6cc   : > { %1441 = vadd.xlane.f32.xlu1 %v1440_v7 }
 0x6ce   : > { %v1435_v8 = vpop.f32.mrf.mxu2 }
 0x73f   : > { %v1442_v9 = vpop.xlane.xlu1 %1441 }
 0x740   : > { %v1443_v10 = vmul.f32 %v1442_v9, %v1317_v33 }
 0x742   : > { %v1444_v11 = vsub.f32 %v1437_v6, %v1443_v10 }
 0x744   : > { %v1445_v12 = vmul.f32 %v1444_v11, %v1444_v11 }
 0x746   : > { %v1446_v13 = vsel %vm641_vm0, %v1445_v12, 0.0 }
 0x747   : > { %1447 = vadd.xlane.f32.xlu1 %v1446_v13 }
 0x7ba   : > { %v1448_v45 = vpop.xlane.xlu1 %1447 }
 0x7bb   : > { %v1449_v14 = vmul.f32 %v1448_v45, %v1317_v33 }
 0x7bd   : > { %v1450_v22 = vadd.f32 1e-05, %v1449_v14 }
 0x7bf   : > { %1831 = vrsqrt.f32 %v1450_v22  ;;  %vm1457_vm13 = vweird.f32 %v1450_v22 }
 0x7c5   : > { %v1832_v15 = vpop.eup %1831 }
 0x7c6   : > { %v1452_v16 = vmul.f32 %v1832_v15, %v1450_v22  ;;  %vm1458_vm12 = vweird.f32 %v1832_v15 }
 0x7c7   : > { %vm1459_vm14 = vmor %vm1457_vm13, %vm1458_vm12 }
 0x7c8   : > { %v1453_v17 = vmul.f32 %v1832_v15, %v1452_v16 }
 0x7ca   : > { %v1454_v18 = vmul.f32 0.5, %v1453_v17 }
 0x7cc   : > { %v1455_v19 = vsub.f32 1.5, %v1454_v18 }
 0x7ce   : > { %v1456_v20 = vmul.f32 %v1832_v15, %v1455_v19 }
 0x7d0   : > { %v1460_v23 = vsel %vm1459_vm14, %v1832_v15, %v1456_v20 }
 0x7d1   : > { %v1461_v24 = vmul.f32 %v1460_v23, %v1444_v11 }
 0x7d3   : > { %v1465_v26 = vmul.f32 %v1801_v21, %v1461_v24 }
 0x7d5   : > { %v1469_v27 = vadd.f32 %v1802_v25, %v1465_v26 }
 0x7d7   : > { %1470 = vst.msk [vmem:[%s606_s24] sm:$0xff] %vm641_vm0, %v1469_v27 }
 0x7d8   : > { %1950 = shalt.err (!%p1947_p2)
}
 0x7d9   : > { %1702 = dma.vmem_to_hbm [thread:$0]  (%p2184_p0), %s1486_s28, 128, %s1488_s10, %s1472_s11  }
 0x7da PF: > { %s2491_s20 = sld [smem:[#allocation14_spill]]  ;;  %p1716_p4 = pnand %p1606_p6, %p2191_p5 }
 0x7dc   : > { %p1717_p7 = pneg %p1716_p4 }
 0x7e0   : > { %s1499_s0 = sand.u32 1, %s2491_s20  }
 0x7e1   : > { %s1500_s6 = scalar_lea.sflag [#allocation6], %s1499_s0 }
 0x7e2   : > { %1984 = dma.done.wait (%p1717_p7), %s1500_s6, 128  }
 0x7e3   : > { %1986 = vsyncadd (%p1717_p7), %s1500_s6, 4294967168  ;;  %s33_s26 = sadd.s32 1, %s2009_s26   ;;  %s2492_s24 = sld [smem:[#allocation15_spill]] }
 0x7e4   : > { %p30_p11 = scmp.ge.s32.totalorder %s33_s26, 4   ;;  %s2493_s25 = sld [smem:[#allocation16_spill]] }
 0x7e5   : > { %s2494_s21 = smov %s1993_s22  ;;  %s2495_s22 = smov %s1997_s23 }
 0x7e6   : > { %s2496_s23 = smov %s2189_s27  ;;  %32 = sbr.rel (!%p30_p11) target bundleno = 17 (0x11), region = 144 }
 0x7eb   :  { %1506 = vsyncpa [#allocation5], 1 }
 0x7ec   :  { %1508 = vsyncpa [#allocation5 + $0x1], 1 }
 0x7ed   :  { %1509 = vsyncpa [#allocation8], 1 }
 0x7ee   :  { %1510 = vsyncpa [#allocation6], 1 }
 0x7ef   :  { %1512 = vsyncpa [#allocation6 + $0x1], 1 }

</bundles_post_ra>
